<compile_context>
chip_gen: v7x
topology: tpu7x:2x2x1
jax: 0.10.0
libtpu: 0.0.40
codegen_flags: <defaults>
</compile_context>

<pallas_src>
import functools

import jax
import jax.numpy as jnp
from jax.experimental import pallas as pl
from jax.experimental.pallas import tpu as pltpu


# ---------------------------------------------------------------------------
# Generation-aware tiling / VMEM budget
# ---------------------------------------------------------------------------
def _vmem_capacity_bytes():
    try:
        return int(pltpu.get_tpu_info().vmem_capacity_bytes)
    except Exception:
        return 64 * 1024 * 1024  # conservative fallback (v7x-sized)


_VMEM_CAP = _vmem_capacity_bytes()
if _VMEM_CAP >= 96 * 1024 * 1024:            # v5e / v6e: 128 MiB physical VMEM
    _MAX_ROW_TILE = 512
    _VMEM_LIMIT = 96 * 1024 * 1024
else:                                        # v7x (64 MiB) or unknown
    _MAX_ROW_TILE = 256
    _VMEM_LIMIT = 48 * 1024 * 1024


def _row_tile(M):
    # Full-dim block when small (always legal), else the largest multiple-of-8
    # row tile that fits this generation's VMEM budget.
    return M if M <= _MAX_ROW_TILE else _MAX_ROW_TILE


# ---------------------------------------------------------------------------
# In-kernel helpers (traced inside Pallas kernels) -- all f32 math
# ---------------------------------------------------------------------------
def _layernorm(x, gamma, beta, eps=1e-5):
    # x: (M, D); gamma/beta: (1, D)  -- matches torch.nn.LayerNorm (biased var)
    mean = jnp.mean(x, axis=-1, keepdims=True)
    var = jnp.mean((x - mean) ** 2, axis=-1, keepdims=True)
    return (x - mean) * jax.lax.rsqrt(var + eps) * gamma + beta


def _gelu_exact(x):
    # torch.nn.GELU() default (erf-based, exact)
    return 0.5 * x * (1.0 + jax.lax.erf(x * 0.7071067811865476))


# ---------------------------------------------------------------------------
# Pallas kernels + wrappers
# ---------------------------------------------------------------------------
def linear_pallas(x_bf, w_bf, b):
    """y = x @ w + b.  x: (M, K) bf16, w: (K, N) bf16, b: (1, N) f32 -> f32."""
    M, K = x_bf.shape
    _, N = w_bf.shape
    TM = _row_tile(M)

    def kernel(x_ref, w_ref, b_ref, o_ref):
        y = jnp.dot(x_ref[...], w_ref[...], preferred_element_type=jnp.float32)
        o_ref[...] = (y + b_ref[...]).astype(o_ref.dtype)

    return pl.pallas_call(
        kernel,
        out_shape=jax.ShapeDtypeStruct((M, N), jnp.float32),
        grid=(pl.cdiv(M, TM),),
        in_specs=[
            pl.BlockSpec((TM, K), lambda i: (i, 0)),
            pl.BlockSpec((K, N), lambda i: (0, 0)),   # weight stays resident
            pl.BlockSpec((1, N), lambda i: (0, 0)),
        ],
        out_specs=pl.BlockSpec((TM, N), lambda i: (i, 0)),
        compiler_params=pltpu.CompilerParams(
            dimension_semantics=("parallel",),
            vmem_limit_bytes=_VMEM_LIMIT),
    )(x_bf, w_bf, b)


def ln_qkv_attn_pallas(x3d, ln_g, ln_b, wqkv_bf, alibi, *, heads):
    """Fused pre-LN + QKV projection + multi-head attention (one layer).

    x3d:     (B, N, D) f32 layer input
    wqkv_bf: (D, 3D) bf16, q columns pre-scaled by 1/sqrt(dh)
    alibi:   (H, N, N) f32 bias, broadcast over batch
    Returns  (B, N, D) bf16 head-concat attention output (before out-proj).

    One grid step per batch element; all heads handled inside the step via
    static lane slices of the in-VMEM (N, 3D) qkv value; the output block is a
    lane-dense (1, N, D) slab so HBM writeback uses unmasked stores.
    """
    B, N, D = x3d.shape
    threeD = wqkv_bf.shape[1]
    H = heads
    dh = D // H

    def kernel(x_ref, g_ref, b_ref, w_ref, al_ref, o_ref):
        xn = _layernorm(x_ref[0], g_ref[...], b_ref[...])          # (N, D) f32
        qkv = jnp.dot(xn.astype(jnp.bfloat16), w_ref[...],
                      preferred_element_type=jnp.float32)          # (N, 3D) f32
        for h in range(H):
            qh = qkv[:, h * dh:(h + 1) * dh].astype(jnp.bfloat16)
            kh = qkv[:, D + h * dh:D + (h + 1) * dh].astype(jnp.bfloat16)
            vh = qkv[:, 2 * D + h * dh:2 * D + (h + 1) * dh].astype(jnp.bfloat16)
            s = jax.lax.dot_general(qh, kh, (((1,), (1,)), ((), ())),
                                    preferred_element_type=jnp.float32)  # (N,N)
            s = s + al_ref[h]
            s = s - jnp.max(s, axis=-1, keepdims=True)
            e = jnp.exp(s)
            p = e * (1.0 / jnp.sum(e, axis=-1, keepdims=True))      # exact div
            oh = jnp.dot(p.astype(jnp.bfloat16), vh,
                         preferred_element_type=jnp.float32)        # (N, dh)
            o_ref[0, :, h * dh:(h + 1) * dh] = oh.astype(o_ref.dtype)

    return pl.pallas_call(
        kernel,
        out_shape=jax.ShapeDtypeStruct((B, N, D), jnp.bfloat16),
        grid=(B,),
        in_specs=[
            pl.BlockSpec((1, N, D), lambda b: (b, 0, 0)),
            pl.BlockSpec((1, D), lambda b: (0, 0)),
            pl.BlockSpec((1, D), lambda b: (0, 0)),
            pl.BlockSpec((D, threeD), lambda b: (0, 0)),    # resident weight
            pl.BlockSpec((H, N, N), lambda b: (0, 0, 0)),   # resident alibi
        ],
        out_specs=pl.BlockSpec((1, N, D), lambda b: (b, 0, 0)),
        compiler_params=pltpu.CompilerParams(
            dimension_semantics=("parallel",),
            vmem_limit_bytes=_VMEM_LIMIT),
    )(x3d, ln_g, ln_b, wqkv_bf, alibi)


def proj_ffn_pallas(attn_flat, x_resid, wout_bf, bout, ln2_g, ln2_b,
                    w1_bf, b1, w2_bf, b2, final_ln=None):
    """Fused: out-proj + residual + pre-LN FFN + residual (+ optional final LN).

    attn_flat: (M, D) bf16 (head-concat attention output)
    x_resid:   (M, D) f32  (layer input, residual source)
    Returns (M, D) f32.
    """
    M, D = x_resid.shape
    inner = w1_bf.shape[1]
    TM = _row_tile(M)
    apply_final = final_ln is not None

    def body(a, xb, wo, bo, g2, be2, w1, bb1, w2, bb2, fg, fb):
        x1 = jnp.dot(a, wo, preferred_element_type=jnp.float32) + bo + xb
        xn2 = _layernorm(x1, g2, be2)
        h = jnp.dot(xn2.astype(jnp.bfloat16), w1,
                    preferred_element_type=jnp.float32) + bb1
        h = _gelu_exact(h)
        out = jnp.dot(h.astype(jnp.bfloat16), w2,
                      preferred_element_type=jnp.float32) + bb2 + x1
        if apply_final:
            out = _layernorm(out, fg, fb)
        return out

    if apply_final:
        def kernel(a_ref, x_ref, wo_ref, bo_ref, g2_ref, be2_ref,
                   w1_ref, b1_ref, w2_ref, b2_ref, fg_ref, fb_ref, o_ref):
            o_ref[...] = body(a_ref[...], x_ref[...], wo_ref[...], bo_ref[...],
                              g2_ref[...], be2_ref[...], w1_ref[...], b1_ref[...],
                              w2_ref[...], b2_ref[...], fg_ref[...], fb_ref[...]
                              ).astype(o_ref.dtype)
    else:
        def kernel(a_ref, x_ref, wo_ref, bo_ref, g2_ref, be2_ref,
                   w1_ref, b1_ref, w2_ref, b2_ref, o_ref):
            o_ref[...] = body(a_ref[...], x_ref[...], wo_ref[...], bo_ref[...],
                              g2_ref[...], be2_ref[...], w1_ref[...], b1_ref[...],
                              w2_ref[...], b2_ref[...], None, None
                              ).astype(o_ref.dtype)

    in_specs = [
        pl.BlockSpec((TM, D), lambda i: (i, 0)),        # attn_flat (bf16)
        pl.BlockSpec((TM, D), lambda i: (i, 0)),        # x_resid  (f32)
        pl.BlockSpec((D, D), lambda i: (0, 0)),         # wout (bf16, resident)
        pl.BlockSpec((1, D), lambda i: (0, 0)),         # bout
        pl.BlockSpec((1, D), lambda i: (0, 0)),         # ln2 gamma
        pl.BlockSpec((1, D), lambda i: (0, 0)),         # ln2 beta
        pl.BlockSpec((D, inner), lambda i: (0, 0)),     # w1 (bf16, resident)
        pl.BlockSpec((1, inner), lambda i: (0, 0)),     # b1
        pl.BlockSpec((inner, D), lambda i: (0, 0)),     # w2 (bf16, resident)
        pl.BlockSpec((1, D), lambda i: (0, 0)),         # b2
    ]
    args = [attn_flat, x_resid, wout_bf, bout, ln2_g, ln2_b, w1_bf, b1, w2_bf, b2]
    if apply_final:
        in_specs += [pl.BlockSpec((1, D), lambda i: (0, 0)),
                     pl.BlockSpec((1, D), lambda i: (0, 0))]
        args += [final_ln[0], final_ln[1]]

    return pl.pallas_call(
        kernel,
        out_shape=jax.ShapeDtypeStruct((M, D), jnp.float32),
        grid=(pl.cdiv(M, TM),),
        in_specs=in_specs,
        out_specs=pl.BlockSpec((TM, D), lambda i: (i, 0)),
        compiler_params=pltpu.CompilerParams(
            dimension_semantics=("parallel",),
            vmem_limit_bytes=_VMEM_LIMIT),
    )(*args)


def layernorm_pallas(x2d, gamma, beta):
    """Standalone final LN (only used when there are zero transformer layers)."""
    M, D = x2d.shape
    TM = _row_tile(M)

    def kernel(x_ref, g_ref, b_ref, o_ref):
        o_ref[...] = _layernorm(x_ref[...], g_ref[...], b_ref[...]).astype(o_ref.dtype)

    return pl.pallas_call(
        kernel,
        out_shape=jax.ShapeDtypeStruct((M, D), x2d.dtype),
        grid=(pl.cdiv(M, TM),),
        in_specs=[pl.BlockSpec((TM, D), lambda i: (i, 0)),
                  pl.BlockSpec((1, D), lambda i: (0, 0)),
                  pl.BlockSpec((1, D), lambda i: (0, 0))],
        out_specs=pl.BlockSpec((TM, D), lambda i: (i, 0)),
        compiler_params=pltpu.CompilerParams(
            dimension_semantics=("parallel",),
            vmem_limit_bytes=_VMEM_LIMIT),
    )(x2d, gamma, beta)


# ---------------------------------------------------------------------------
# One-time weight preparation (outside the jitted hot path)
# ---------------------------------------------------------------------------
def prepare_vit_params(params, *, heads):
    """Cast weights to bf16 and fold the 1/sqrt(dh) scale into wqkv q-columns."""
    D = params["w_in"].shape[1]
    dh = D // heads
    scale = dh ** (-0.5)
    col_scale = jnp.concatenate(
        [jnp.full((D,), scale, jnp.float32), jnp.ones((2 * D,), jnp.float32)]
    )[None, :]

    prepped = {
        "w_in": params["w_in"].astype(jnp.bfloat16),
        "b_in": params["b_in"],
        "gamma_out": params["gamma_out"],
        "beta_out": params["beta_out"],
        "layers": [],
    }
    for lp in params["layers"]:
        prepped["layers"].append({
            "ln1_g": lp["ln1_g"], "ln1_b": lp["ln1_b"],
            "wqkv": (lp["wqkv"] * col_scale).astype(jnp.bfloat16),
            "wout": lp["wout"].astype(jnp.bfloat16), "bout": lp["bout"],
            "ln2_g": lp["ln2_g"], "ln2_b": lp["ln2_b"],
            "w1": lp["w1"].astype(jnp.bfloat16), "b1": lp["b1"],
            "w2": lp["w2"].astype(jnp.bfloat16), "b2": lp["b2"],
        })
    return prepped


# ---------------------------------------------------------------------------
# ViT forward (mask_info=None path) -- expects prepare_vit_params() output
# ---------------------------------------------------------------------------
def vit_forward(imgs, attn_bias, prepped, *, patch_size, heads):
    B, C, Himg, Wimg = imgs.shape
    p = patch_size
    h, w = Himg // p, Wimg // p
    N = h * w
    D = prepped["w_in"].shape[1]
    M = B * N

    # 'b c (h i) (w j) -> b (h w) (c i j)'   (glue, plain JAX)
    x = imgs.reshape(B, C, h, p, w, p)
    x = x.transpose(0, 2, 4, 1, 3, 5).reshape(M, C * p * p)

    # linear_input (bf16 matmul inputs, f32 accumulate/output)
    x = linear_pallas(x.astype(jnp.bfloat16), prepped["w_in"], prepped["b_in"])

    n_layers = len(prepped["layers"])
    for li, lp in enumerate(prepped["layers"]):
        # fused LN1 + QKV + multi-head attention, one grid step per batch elem
        attn = ln_qkv_attn_pallas(x.reshape(B, N, D), lp["ln1_g"], lp["ln1_b"],
                                  lp["wqkv"], attn_bias, heads=heads)
        attn_flat = attn.reshape(M, D)            # contiguous reshape (free)

        # fused: out-proj + residual + FFN + residual (+ final LN on last layer)
        final_ln = ((prepped["gamma_out"], prepped["beta_out"])
                    if li == n_layers - 1 else None)
        x = proj_ffn_pallas(attn_flat, x, lp["wout"], lp["bout"],
                            lp["ln2_g"], lp["ln2_b"],
                            lp["w1"], lp["b1"], lp["w2"], lp["b2"],
                            final_ln=final_ln)                  # (M, D) f32

    if n_layers == 0:
        x = layernorm_pallas(x, prepped["gamma_out"], prepped["beta_out"])

    return x.reshape(B, N, D)


# ---------------------------------------------------------------------------
# Pure-JAX f32 reference (for correctness check)
# ---------------------------------------------------------------------------
def vit_reference(imgs, attn_bias, params, *, patch_size, heads):
    B, C, Himg, Wimg = imgs.shape
    p = patch_size
    h, w = Himg // p, Wimg // p
    N = h * w
    D = params["w_in"].shape[1]
    dh = D // heads
    scale = dh ** (-0.5)

    def ln(v, g, b):
        m = v.mean(-1, keepdims=True)
        var = ((v - m) ** 2).mean(-1, keepdims=True)
        return (v - m) * jax.lax.rsqrt(var + 1e-5) * g + b

    x = imgs.reshape(B, C, h, p, w, p).transpose(0, 2, 4, 1, 3, 5)
    x = x.reshape(B, N, C * p * p)
    x = x @ params["w_in"] + params["b_in"]
    for lp in params["layers"]:
        xn = ln(x, lp["ln1_g"], lp["ln1_b"])
        qkv = xn @ lp["wqkv"]
        q, k, v = jnp.split(qkv, 3, axis=-1)
        sp = lambda t: t.reshape(B, N, heads, dh).transpose(0, 2, 1, 3)
        q, k, v = sp(q), sp(k), sp(v)
        s = jnp.einsum("bhid,bhjd->bhij", q, k) * scale + attn_bias[None]
        a = jax.nn.softmax(s, axis=-1)
        o = jnp.einsum("bhij,bhjd->bhid", a, v)
        o = o.transpose(0, 2, 1, 3).reshape(B, N, D)
        x = o @ lp["wout"] + lp["bout"] + x
        xn2 = ln(x, lp["ln2_g"], lp["ln2_b"])
        hid = xn2 @ lp["w1"] + lp["b1"]
        hid = 0.5 * hid * (1.0 + jax.lax.erf(hid * 0.7071067811865476))
        x = hid @ lp["w2"] + lp["b2"] + x
    return ln(x, params["gamma_out"], params["beta_out"])


def init_vit_params(key, *, in_channels, patch_size, dim, layers, ff_mult=4):
    ppp = patch_size * patch_size * in_channels
    inner = dim * ff_mult
    keys = iter(jax.random.split(key, 4 + layers * 8))

    def nrm(shape, scale=0.02):
        return jax.random.normal(next(keys), shape, jnp.float32) * scale

    params = {
        "w_in": nrm((ppp, dim)),
        "b_in": nrm((1, dim)),
        "gamma_out": jnp.ones((1, dim), jnp.float32),
        "beta_out": jnp.zeros((1, dim), jnp.float32),
        "layers": [],
    }
    for _ in range(layers):
        params["layers"].append({
            "ln1_g": jnp.ones((1, dim), jnp.float32),
            "ln1_b": jnp.zeros((1, dim), jnp.float32),
            "wqkv": nrm((dim, 3 * dim)),        # create_qkv (no bias)
            "wout": nrm((dim, dim)),
            "bout": nrm((1, dim)),
            "ln2_g": jnp.ones((1, dim), jnp.float32),
            "ln2_b": jnp.zeros((1, dim), jnp.float32),
            "w1": nrm((dim, inner)),
            "b1": nrm((1, inner)),
            "w2": nrm((inner, dim)),
            "b2": nrm((1, dim)),
        })
    return params


if __name__ == "__main__":
    # Small shapes consistent with the module.
    B, C, IMG = 2, 4, 16
    PATCH = 8
    DIM = 64
    LAYERS = 2
    HEADS = 4
    NUM_PATCHES = (IMG // PATCH) ** 2  # 4

    key = jax.random.PRNGKey(0)
    k_img, k_bias, k_par = jax.random.split(key, 3)

    imgs = jax.random.normal(k_img, (B, C, IMG, IMG), jnp.float32)
    # alibi-style bias, broadcast over batch: (H, N, N)
    attn_bias = 0.1 * jax.random.normal(k_bias, (HEADS, NUM_PATCHES, NUM_PATCHES),
                                        jnp.float32)
    params = init_vit_params(k_par, in_channels=C, patch_size=PATCH,
                             dim=DIM, layers=LAYERS)

    # One-time weight prep (bf16 casts + scale fold) OUTSIDE the hot path.
    prepped = prepare_vit_params(params, heads=HEADS)

    fwd = jax.jit(functools.partial(vit_forward, patch_size=PATCH, heads=HEADS))
    out = fwd(imgs, attn_bias, prepped)
    jax.block_until_ready(out)
    assert out.shape == (B, NUM_PATCHES, DIM)

    # Correctness vs. a pure-JAX f32 reference (bf16 MXU inputs => loose tol).
    ref = vit_reference(imgs, attn_bias, params, patch_size=PATCH, heads=HEADS)
    max_err = float(jnp.max(jnp.abs(out - ref)))
    assert bool(jnp.all(jnp.isfinite(out)))
    assert max_err < 0.1, f"max abs error vs reference too large: {max_err}"

    print("KERNEL_OK")
</pallas_src>

<mosaic_0001>
module attributes {stable_mosaic.version = 11 : i64} {
  func.func @kernel(%arg0: i32, %arg1: memref<8x256xbf16, #tpu.memory_space<vmem>>, %arg2: memref<256x64xbf16, #tpu.memory_space<vmem>>, %arg3: memref<1x64xf32, #tpu.memory_space<vmem>>, %arg4: memref<8x64xf32, #tpu.memory_space<vmem>>) attributes {dimension_semantics = [#tpu.dimension_semantics<parallel>], iteration_bounds = array<i64: 1>, scalar_prefetch = 0 : i64, scratch_operands = 0 : i64, tpu.core_type = #tpu.core_type<tc>, window_params = [{transform_indices = @transform_0, window_bounds = array<i64: 8, 256>}, {pipeline_mode = #tpu.pipeline_mode<synchronous>, transform_indices = @transform_1, window_bounds = array<i64: 256, 64>}, {pipeline_mode = #tpu.pipeline_mode<synchronous>, transform_indices = @transform_2, window_bounds = array<i64: 1, 64>}, {transform_indices = @transform_3, window_bounds = array<i64: 8, 64>}]} {
    %c0 = arith.constant 0 : index
    %c0_0 = arith.constant 0 : index
    %0 = vector.load %arg1[%c0, %c0_0] : memref<8x256xbf16, #tpu.memory_space<vmem>>, vector<8x256xbf16>
    %c0_1 = arith.constant 0 : index
    %c0_2 = arith.constant 0 : index
    %1 = vector.load %arg2[%c0_1, %c0_2] : memref<256x64xbf16, #tpu.memory_space<vmem>>, vector<256x64xbf16>
    %cst = arith.constant dense<0.000000e+00> : vector<8x64xf32>
    %2 = tpu.matmul %0, %1, %cst {dimension_numbers = #tpu.dot_dimension_numbers<[1], [0], [0], [1], [0, 0, 1, 1], [], []>} : vector<8x256xbf16>, vector<256x64xbf16>, vector<8x64xf32> -> vector<8x64xf32>
    %c0_3 = arith.constant 0 : index
    %c0_4 = arith.constant 0 : index
    %3 = vector.load %arg3[%c0_3, %c0_4] : memref<1x64xf32, #tpu.memory_space<vmem>>, vector<1x64xf32>
    %4 = vector.broadcast %3 : vector<1x64xf32> to vector<8x64xf32>
    %5 = arith.addf %2, %4 : vector<8x64xf32>
    %c0_5 = arith.constant 0 : index
    %c0_6 = arith.constant 0 : index
    %6 = vector.load %arg4[%c0_5, %c0_6] : memref<8x64xf32, #tpu.memory_space<vmem>>, vector<8x64xf32>
    tpu.vector_store %arg4[%c0_5, %c0_6], %5 {strides = array<i32>} : memref<8x64xf32, #tpu.memory_space<vmem>>, vector<8x64xf32>,
    return
  }
  func.func @transform_0(%arg0: i32) -> (i32, i32) {
    %c0_i32 = arith.constant 0 : i32
    %c0_i32_0 = arith.constant 0 : i32
    return %arg0, %c0_i32 : i32, i32
  }
  func.func @transform_1(%arg0: i32) -> (i32, i32) {
    %c0_i32 = arith.constant 0 : i32
    %c0_i32_0 = arith.constant 0 : i32
    %c0_i32_1 = arith.constant 0 : i32
    return %c0_i32, %c0_i32_0 : i32, i32
  }
  func.func @transform_2(%arg0: i32) -> (i32, i32) {
    %c0_i32 = arith.constant 0 : i32
    %c0_i32_0 = arith.constant 0 : i32
    %c0_i32_1 = arith.constant 0 : i32
    return %c0_i32, %c0_i32_0 : i32, i32
  }
  func.func @transform_3(%arg0: i32) -> (i32, i32) {
    %c0_i32 = arith.constant 0 : i32
    %c0_i32_0 = arith.constant 0 : i32
    return %arg0, %c0_i32 : i32, i32
  }
}

module attributes {stable_mosaic.version = 11 : i64} {
  func.func @kernel(%arg0: i32, %arg1: memref<8x64xbf16, #tpu.memory_space<vmem>>, %arg2: memref<8x64xf32, #tpu.memory_space<vmem>>, %arg3: memref<64x64xbf16, #tpu.memory_space<vmem>>, %arg4: memref<1x64xf32, #tpu.memory_space<vmem>>, %arg5: memref<1x64xf32, #tpu.memory_space<vmem>>, %arg6: memref<1x64xf32, #tpu.memory_space<vmem>>, %arg7: memref<64x256xbf16, #tpu.memory_space<vmem>>, %arg8: memref<1x256xf32, #tpu.memory_space<vmem>>, %arg9: memref<256x64xbf16, #tpu.memory_space<vmem>>, %arg10: memref<1x64xf32, #tpu.memory_space<vmem>>, %arg11: memref<8x64xf32, #tpu.memory_space<vmem>>) attributes {dimension_semantics = [#tpu.dimension_semantics<parallel>], iteration_bounds = array<i64: 1>, scalar_prefetch = 0 : i64, scratch_operands = 0 : i64, tpu.core_type = #tpu.core_type<tc>, window_params = [{transform_indices = @transform_0, window_bounds = array<i64: 8, 64>}, {transform_indices = @transform_1, window_bounds = array<i64: 8, 64>}, {pipeline_mode = #tpu.pipeline_mode<synchronous>, transform_indices = @transform_2, window_bounds = array<i64: 64, 64>}, {pipeline_mode = #tpu.pipeline_mode<synchronous>, transform_indices = @transform_3, window_bounds = array<i64: 1, 64>}, {pipeline_mode = #tpu.pipeline_mode<synchronous>, transform_indices = @transform_4, window_bounds = array<i64: 1, 64>}, {pipeline_mode = #tpu.pipeline_mode<synchronous>, transform_indices = @transform_5, window_bounds = array<i64: 1, 64>}, {pipeline_mode = #tpu.pipeline_mode<synchronous>, transform_indices = @transform_6, window_bounds = array<i64: 64, 256>}, {pipeline_mode = #tpu.pipeline_mode<synchronous>, transform_indices = @transform_7, window_bounds = array<i64: 1, 256>}, {pipeline_mode = #tpu.pipeline_mode<synchronous>, transform_indices = @transform_8, window_bounds = array<i64: 256, 64>}, {pipeline_mode = #tpu.pipeline_mode<synchronous>, transform_indices = @transform_9, window_bounds = array<i64: 1, 64>}, {transform_indices = @transform_10, window_bounds = array<i64: 8, 64>}]} {
    %c0 = arith.constant 0 : index
    %c0_0 = arith.constant 0 : index
    %0 = vector.load %arg1[%c0, %c0_0] : memref<8x64xbf16, #tpu.memory_space<vmem>>, vector<8x64xbf16>
    %c0_1 = arith.constant 0 : index
    %c0_2 = arith.constant 0 : index
    %1 = vector.load %arg2[%c0_1, %c0_2] : memref<8x64xf32, #tpu.memory_space<vmem>>, vector<8x64xf32>
    %c0_3 = arith.constant 0 : index
    %c0_4 = arith.constant 0 : index
    %2 = vector.load %arg3[%c0_3, %c0_4] : memref<64x64xbf16, #tpu.memory_space<vmem>>, vector<64x64xbf16>
    %c0_5 = arith.constant 0 : index
    %c0_6 = arith.constant 0 : index
    %3 = vector.load %arg4[%c0_5, %c0_6] : memref<1x64xf32, #tpu.memory_space<vmem>>, vector<1x64xf32>
    %c0_7 = arith.constant 0 : index
    %c0_8 = arith.constant 0 : index
    %4 = vector.load %arg5[%c0_7, %c0_8] : memref<1x64xf32, #tpu.memory_space<vmem>>, vector<1x64xf32>
    %c0_9 = arith.constant 0 : index
    %c0_10 = arith.constant 0 : index
    %5 = vector.load %arg6[%c0_9, %c0_10] : memref<1x64xf32, #tpu.memory_space<vmem>>, vector<1x64xf32>
    %c0_11 = arith.constant 0 : index
    %c0_12 = arith.constant 0 : index
    %6 = vector.load %arg7[%c0_11, %c0_12] : memref<64x256xbf16, #tpu.memory_space<vmem>>, vector<64x256xbf16>
    %c0_13 = arith.constant 0 : index
    %c0_14 = arith.constant 0 : index
    %7 = vector.load %arg8[%c0_13, %c0_14] : memref<1x256xf32, #tpu.memory_space<vmem>>, vector<1x256xf32>
    %c0_15 = arith.constant 0 : index
    %c0_16 = arith.constant 0 : index
    %8 = vector.load %arg9[%c0_15, %c0_16] : memref<256x64xbf16, #tpu.memory_space<vmem>>, vector<256x64xbf16>
    %c0_17 = arith.constant 0 : index
    %c0_18 = arith.constant 0 : index
    %9 = vector.load %arg10[%c0_17, %c0_18] : memref<1x64xf32, #tpu.memory_space<vmem>>, vector<1x64xf32>
    %cst = arith.constant dense<0.000000e+00> : vector<8x64xf32>
    %10 = tpu.matmul %0, %2, %cst {dimension_numbers = #tpu.dot_dimension_numbers<[1], [0], [0], [1], [0, 0, 1, 1], [], []>} : vector<8x64xbf16>, vector<64x64xbf16>, vector<8x64xf32> -> vector<8x64xf32>
    %11 = vector.broadcast %3 : vector<1x64xf32> to vector<8x64xf32>
    %12 = arith.addf %10, %11 : vector<8x64xf32>
    %13 = arith.addf %12, %1 : vector<8x64xf32>
    %cst_19 = arith.constant dense<0.000000e+00> : vector<8xf32>
    %14 = vector.multi_reduction <add>, %13, %cst_19 [1] : vector<8x64xf32> to vector<8xf32>
    %15 = vector.shape_cast %14 : vector<8xf32> to vector<8x1xf32>
    %cst_20 = arith.constant 6.400000e+01 : f32
    %16 = vector.broadcast %cst_20 : f32 to vector<8x1xf32>
    %17 = arith.divf %15, %16 : vector<8x1xf32>
    %18 = vector.broadcast %17 : vector<8x1xf32> to vector<8x64xf32>
    %19 = arith.subf %13, %18 : vector<8x64xf32>
    %20 = arith.mulf %19, %19 : vector<8x64xf32>
    %cst_21 = arith.constant dense<0.000000e+00> : vector<8xf32>
    %21 = vector.multi_reduction <add>, %20, %cst_21 [1] : vector<8x64xf32> to vector<8xf32>
    %22 = vector.shape_cast %21 : vector<8xf32> to vector<8x1xf32>
    %cst_22 = arith.constant 6.400000e+01 : f32
    %23 = vector.broadcast %cst_22 : f32 to vector<8x1xf32>
    %24 = arith.divf %22, %23 : vector<8x1xf32>
    %25 = vector.broadcast %17 : vector<8x1xf32> to vector<8x64xf32>
    %26 = arith.subf %13, %25 : vector<8x64xf32>
    %cst_23 = arith.constant 9.99999974E-6 : f32
    %27 = vector.broadcast %cst_23 : f32 to vector<8x1xf32>
    %28 = arith.addf %24, %27 : vector<8x1xf32>
    %29 = math.rsqrt %28 : vector<8x1xf32>
    %30 = vector.broadcast %29 : vector<8x1xf32> to vector<8x64xf32>
    %31 = arith.mulf %26, %30 : vector<8x64xf32>
    %32 = vector.broadcast %4 : vector<1x64xf32> to vector<8x64xf32>
    %33 = arith.mulf %31, %32 : vector<8x64xf32>
    %34 = vector.broadcast %5 : vector<1x64xf32> to vector<8x64xf32>
    %35 = arith.addf %33, %34 : vector<8x64xf32>
    %36 = arith.truncf %35 : vector<8x64xf32> to vector<8x64xbf16>
    %cst_24 = arith.constant dense<0.000000e+00> : vector<8x256xf32>
    %37 = tpu.matmul %36, %6, %cst_24 {dimension_numbers = #tpu.dot_dimension_numbers<[1], [0], [0], [1], [0, 0, 1, 1], [], []>} : vector<8x64xbf16>, vector<64x256xbf16>, vector<8x256xf32> -> vector<8x256xf32>
    %38 = vector.broadcast %7 : vector<1x256xf32> to vector<8x256xf32>
    %39 = arith.addf %37, %38 : vector<8x256xf32>
    %cst_25 = arith.constant 5.000000e-01 : f32
    %40 = vector.broadcast %cst_25 : f32 to vector<8x256xf32>
    %41 = arith.mulf %40, %39 : vector<8x256xf32>
    %cst_26 = arith.constant 0.707106769 : f32
    %42 = vector.broadcast %cst_26 : f32 to vector<8x256xf32>
    %43 = arith.mulf %39, %42 : vector<8x256xf32>
    %44 = math.erf %43 : vector<8x256xf32>
    %cst_27 = arith.constant 1.000000e+00 : f32
    %45 = vector.broadcast %cst_27 : f32 to vector<8x256xf32>
    %46 = arith.addf %45, %44 : vector<8x256xf32>
    %47 = arith.mulf %41, %46 : vector<8x256xf32>
    %48 = arith.truncf %47 : vector<8x256xf32> to vector<8x256xbf16>
    %cst_28 = arith.constant dense<0.000000e+00> : vector<8x64xf32>
    %49 = tpu.matmul %48, %8, %cst_28 {dimension_numbers = #tpu.dot_dimension_numbers<[1], [0], [0], [1], [0, 0, 1, 1], [], []>} : vector<8x256xbf16>, vector<256x64xbf16>, vector<8x64xf32> -> vector<8x64xf32>
    %50 = vector.broadcast %9 : vector<1x64xf32> to vector<8x64xf32>
    %51 = arith.addf %49, %50 : vector<8x64xf32>
    %52 = arith.addf %51, %13 : vector<8x64xf32>
    %c0_29 = arith.constant 0 : index
    %c0_30 = arith.constant 0 : index
    %53 = vector.load %arg11[%c0_29, %c0_30] : memref<8x64xf32, #tpu.memory_space<vmem>>, vector<8x64xf32>
    tpu.vector_store %arg11[%c0_29, %c0_30], %52 {strides = array<i32>} : memref<8x64xf32, #tpu.memory_space<vmem>>, vector<8x64xf32>,
    return
  }
  func.func @transform_0(%arg0: i32) -> (i32, i32) {
    %c0_i32 = arith.constant 0 : i32
    %c0_i32_0 = arith.constant 0 : i32
    return %arg0, %c0_i32 : i32, i32
  }
  func.func @transform_1(%arg0: i32) -> (i32, i32) {
    %c0_i32 = arith.constant 0 : i32
    %c0_i32_0 = arith.constant 0 : i32
    return %arg0, %c0_i32 : i32, i32
  }
  func.func @transform_2(%arg0: i32) -> (i32, i32) {
    %c0_i32 = arith.constant 0 : i32
    %c0_i32_0 = arith.constant 0 : i32
    %c0_i32_1 = arith.constant 0 : i32
    return %c0_i32, %c0_i32_0 : i32, i32
  }
  func.func @transform_3(%arg0: i32) -> (i32, i32) {
    %c0_i32 = arith.constant 0 : i32
    %c0_i32_0 = arith.constant 0 : i32
    %c0_i32_1 = arith.constant 0 : i32
    return %c0_i32, %c0_i32_0 : i32, i32
  }
  func.func @transform_4(%arg0: i32) -> (i32, i32) {
    %c0_i32 = arith.constant 0 : i32
    %c0_i32_0 = arith.constant 0 : i32
    %c0_i32_1 = arith.constant 0 : i32
    return %c0_i32, %c0_i32_0 : i32, i32
  }
  func.func @transform_5(%arg0: i32) -> (i32, i32) {
    %c0_i32 = arith.constant 0 : i32
    %c0_i32_0 = arith.constant 0 : i32
    %c0_i32_1 = arith.constant 0 : i32
    return %c0_i32, %c0_i32_0 : i32, i32
  }
  func.func @transform_6(%arg0: i32) -> (i32, i32) {
    %c0_i32 = arith.constant 0 : i32
    %c0_i32_0 = arith.constant 0 : i32
    %c0_i32_1 = arith.constant 0 : i32
    return %c0_i32, %c0_i32_0 : i32, i32
  }
  func.func @transform_7(%arg0: i32) -> (i32, i32) {
    %c0_i32 = arith.constant 0 : i32
    %c0_i32_0 = arith.constant 0 : i32
    %c0_i32_1 = arith.constant 0 : i32
    return %c0_i32, %c0_i32_0 : i32, i32
  }
  func.func @transform_8(%arg0: i32) -> (i32, i32) {
    %c0_i32 = arith.constant 0 : i32
    %c0_i32_0 = arith.constant 0 : i32
    %c0_i32_1 = arith.constant 0 : i32
    return %c0_i32, %c0_i32_0 : i32, i32
  }
  func.func @transform_9(%arg0: i32) -> (i32, i32) {
    %c0_i32 = arith.constant 0 : i32
    %c0_i32_0 = arith.constant 0 : i32
    %c0_i32_1 = arith.constant 0 : i32
    return %c0_i32, %c0_i32_0 : i32, i32
  }
  func.func @transform_10(%arg0: i32) -> (i32, i32) {
    %c0_i32 = arith.constant 0 : i32
    %c0_i32_0 = arith.constant 0 : i32
    return %arg0, %c0_i32 : i32, i32
  }
}

module attributes {stable_mosaic.version = 11 : i64} {
  func.func @kernel(%arg0: i32, %arg1: memref<1x4x64xf32, #tpu.memory_space<vmem>>, %arg2: memref<1x64xf32, #tpu.memory_space<vmem>>, %arg3: memref<1x64xf32, #tpu.memory_space<vmem>>, %arg4: memref<64x192xbf16, #tpu.memory_space<vmem>>, %arg5: memref<4x4x4xf32, #tpu.memory_space<vmem>>, %arg6: memref<1x4x64xbf16, #tpu.memory_space<vmem>>) attributes {dimension_semantics = [#tpu.dimension_semantics<parallel>], iteration_bounds = array<i64: 2>, scalar_prefetch = 0 : i64, scratch_operands = 0 : i64, tpu.core_type = #tpu.core_type<tc>, window_params = [{transform_indices = @transform_0, window_bounds = array<i64: 1, 4, 64>}, {pipeline_mode = #tpu.pipeline_mode<synchronous>, transform_indices = @transform_1, window_bounds = array<i64: 1, 64>}, {pipeline_mode = #tpu.pipeline_mode<synchronous>, transform_indices = @transform_2, window_bounds = array<i64: 1, 64>}, {pipeline_mode = #tpu.pipeline_mode<synchronous>, transform_indices = @transform_3, window_bounds = array<i64: 64, 192>}, {pipeline_mode = #tpu.pipeline_mode<synchronous>, transform_indices = @transform_4, window_bounds = array<i64: 4, 4, 4>}, {transform_indices = @transform_5, window_bounds = array<i64: 1, 4, 64>}]} {
    %c0 = arith.constant 0 : index
    %c0_0 = arith.constant 0 : index
    %c0_1 = arith.constant 0 : index
    %0 = vector.load %arg1[%c0, %c0_0, %c0_1] : memref<1x4x64xf32, #tpu.memory_space<vmem>>, vector<1x4x64xf32>
    %1 = vector.shape_cast %0 : vector<1x4x64xf32> to vector<4x64xf32>
    %c0_2 = arith.constant 0 : index
    %c0_3 = arith.constant 0 : index
    %2 = vector.load %arg2[%c0_2, %c0_3] : memref<1x64xf32, #tpu.memory_space<vmem>>, vector<1x64xf32>
    %c0_4 = arith.constant 0 : index
    %c0_5 = arith.constant 0 : index
    %3 = vector.load %arg3[%c0_4, %c0_5] : memref<1x64xf32, #tpu.memory_space<vmem>>, vector<1x64xf32>
    %cst = arith.constant dense<0.000000e+00> : vector<4xf32>
    %4 = vector.multi_reduction <add>, %1, %cst [1] : vector<4x64xf32> to vector<4xf32>
    %5 = vector.shape_cast %4 : vector<4xf32> to vector<4x1xf32>
    %cst_6 = arith.constant 6.400000e+01 : f32
    %6 = vector.broadcast %cst_6 : f32 to vector<4x1xf32>
    %7 = arith.divf %5, %6 : vector<4x1xf32>
    %8 = vector.broadcast %7 : vector<4x1xf32> to vector<4x64xf32>
    %9 = arith.subf %1, %8 : vector<4x64xf32>
    %10 = arith.mulf %9, %9 : vector<4x64xf32>
    %cst_7 = arith.constant dense<0.000000e+00> : vector<4xf32>
    %11 = vector.multi_reduction <add>, %10, %cst_7 [1] : vector<4x64xf32> to vector<4xf32>
    %12 = vector.shape_cast %11 : vector<4xf32> to vector<4x1xf32>
    %cst_8 = arith.constant 6.400000e+01 : f32
    %13 = vector.broadcast %cst_8 : f32 to vector<4x1xf32>
    %14 = arith.divf %12, %13 : vector<4x1xf32>
    %15 = vector.broadcast %7 : vector<4x1xf32> to vector<4x64xf32>
    %16 = arith.subf %1, %15 : vector<4x64xf32>
    %cst_9 = arith.constant 9.99999974E-6 : f32
    %17 = vector.broadcast %cst_9 : f32 to vector<4x1xf32>
    %18 = arith.addf %14, %17 : vector<4x1xf32>
    %19 = math.rsqrt %18 : vector<4x1xf32>
    %20 = vector.broadcast %19 : vector<4x1xf32> to vector<4x64xf32>
    %21 = arith.mulf %16, %20 : vector<4x64xf32>
    %22 = vector.broadcast %2 : vector<1x64xf32> to vector<4x64xf32>
    %23 = arith.mulf %21, %22 : vector<4x64xf32>
    %24 = vector.broadcast %3 : vector<1x64xf32> to vector<4x64xf32>
    %25 = arith.addf %23, %24 : vector<4x64xf32>
    %26 = arith.truncf %25 : vector<4x64xf32> to vector<4x64xbf16>
    %c0_10 = arith.constant 0 : index
    %c0_11 = arith.constant 0 : index
    %27 = vector.load %arg4[%c0_10, %c0_11] : memref<64x192xbf16, #tpu.memory_space<vmem>>, vector<64x192xbf16>
    %cst_12 = arith.constant dense<0.000000e+00> : vector<4x192xf32>
    %28 = tpu.matmul %26, %27, %cst_12 {dimension_numbers = #tpu.dot_dimension_numbers<[1], [0], [0], [1], [0, 0, 1, 1], [], []>} : vector<4x64xbf16>, vector<64x192xbf16>, vector<4x192xf32> -> vector<4x192xf32>
    %29 = vector.extract_strided_slice %28 {offsets = [0, 0], sizes = [4, 16], strides = [1, 1]} : vector<4x192xf32> to vector<4x16xf32>
    %30 = arith.truncf %29 : vector<4x16xf32> to vector<4x16xbf16>
    %31 = vector.extract_strided_slice %28 {offsets = [0, 64], sizes = [4, 16], strides = [1, 1]} : vector<4x192xf32> to vector<4x16xf32>
    %32 = arith.truncf %31 : vector<4x16xf32> to vector<4x16xbf16>
    %33 = vector.extract_strided_slice %28 {offsets = [0, 128], sizes = [4, 16], strides = [1, 1]} : vector<4x192xf32> to vector<4x16xf32>
    %34 = arith.truncf %33 : vector<4x16xf32> to vector<4x16xbf16>
    %cst_13 = arith.constant dense<0.000000e+00> : vector<4x4xf32>
    %35 = tpu.matmul %30, %32, %cst_13 {dimension_numbers = #tpu.dot_dimension_numbers<[1], [1], [0], [0], [0, 0, 1, 0], [], []>} : vector<4x16xbf16>, vector<4x16xbf16>, vector<4x4xf32> -> vector<4x4xf32>
    %c0_14 = arith.constant 0 : index
    %c0_15 = arith.constant 0 : index
    %c0_16 = arith.constant 0 : index
    %36 = vector.load %arg5[%c0_14, %c0_15, %c0_16] : memref<4x4x4xf32, #tpu.memory_space<vmem>>, vector<1x4x4xf32>
    %37 = vector.shape_cast %36 : vector<1x4x4xf32> to vector<4x4xf32>
    %38 = arith.addf %35, %37 : vector<4x4xf32>
    %cst_17 = arith.constant dense<0xFF800000> : vector<4xf32>
    %39 = vector.multi_reduction <maximumf>, %38, %cst_17 [1] : vector<4x4xf32> to vector<4xf32>
    %40 = vector.shape_cast %39 : vector<4xf32> to vector<4x1xf32>
    %41 = vector.broadcast %40 : vector<4x1xf32> to vector<4x4xf32>
    %42 = arith.subf %38, %41 : vector<4x4xf32>
    %43 = math.exp %42 : vector<4x4xf32>
    %cst_18 = arith.constant dense<0.000000e+00> : vector<4xf32>
    %44 = vector.multi_reduction <add>, %43, %cst_18 [1] : vector<4x4xf32> to vector<4xf32>
    %45 = vector.shape_cast %44 : vector<4xf32> to vector<4x1xf32>
    %cst_19 = arith.constant 1.000000e+00 : f32
    %46 = vector.broadcast %cst_19 : f32 to vector<4x1xf32>
    %47 = arith.divf %46, %45 : vector<4x1xf32>
    %48 = vector.broadcast %47 : vector<4x1xf32> to vector<4x4xf32>
    %49 = arith.mulf %43, %48 : vector<4x4xf32>
    %50 = arith.truncf %49 : vector<4x4xf32> to vector<4x4xbf16>
    %cst_20 = arith.constant dense<0.000000e+00> : vector<4x16xf32>
    %51 = tpu.matmul %50, %34, %cst_20 {dimension_numbers = #tpu.dot_dimension_numbers<[1], [0], [0], [1], [0, 0, 1, 1], [], []>} : vector<4x4xbf16>, vector<4x16xbf16>, vector<4x16xf32> -> vector<4x16xf32>
    %52 = arith.truncf %51 : vector<4x16xf32> to vector<4x16xbf16>
    %c0_21 = arith.constant 0 : index
    %c0_22 = arith.constant 0 : index
    %c0_23 = arith.constant 0 : index
    %53 = vector.load %arg6[%c0_21, %c0_22, %c0_23] : memref<1x4x64xbf16, #tpu.memory_space<vmem>>, vector<1x4x16xbf16>
    %54 = vector.shape_cast %53 : vector<1x4x16xbf16> to vector<4x16xbf16>
    %55 = vector.shape_cast %52 : vector<4x16xbf16> to vector<1x4x16xbf16>
    tpu.vector_store %arg6[%c0_21, %c0_22, %c0_23], %55 {strides = array<i32>} : memref<1x4x64xbf16, #tpu.memory_space<vmem>>, vector<1x4x16xbf16>,
    %56 = vector.extract_strided_slice %28 {offsets = [0, 16], sizes = [4, 16], strides = [1, 1]} : vector<4x192xf32> to vector<4x16xf32>
    %57 = arith.truncf %56 : vector<4x16xf32> to vector<4x16xbf16>
    %58 = vector.extract_strided_slice %28 {offsets = [0, 80], sizes = [4, 16], strides = [1, 1]} : vector<4x192xf32> to vector<4x16xf32>
    %59 = arith.truncf %58 : vector<4x16xf32> to vector<4x16xbf16>
    %60 = vector.extract_strided_slice %28 {offsets = [0, 144], sizes = [4, 16], strides = [1, 1]} : vector<4x192xf32> to vector<4x16xf32>
    %61 = arith.truncf %60 : vector<4x16xf32> to vector<4x16xbf16>
    %cst_24 = arith.constant dense<0.000000e+00> : vector<4x4xf32>
    %62 = tpu.matmul %57, %59, %cst_24 {dimension_numbers = #tpu.dot_dimension_numbers<[1], [1], [0], [0], [0, 0, 1, 0], [], []>} : vector<4x16xbf16>, vector<4x16xbf16>, vector<4x4xf32> -> vector<4x4xf32>
    %c1 = arith.constant 1 : index
    %c0_25 = arith.constant 0 : index
    %c0_26 = arith.constant 0 : index
    %63 = vector.load %arg5[%c1, %c0_25, %c0_26] : memref<4x4x4xf32, #tpu.memory_space<vmem>>, vector<1x4x4xf32>
    %64 = vector.shape_cast %63 : vector<1x4x4xf32> to vector<4x4xf32>
    %65 = arith.addf %62, %64 : vector<4x4xf32>
    %cst_27 = arith.constant dense<0xFF800000> : vector<4xf32>
    %66 = vector.multi_reduction <maximumf>, %65, %cst_27 [1] : vector<4x4xf32> to vector<4xf32>
    %67 = vector.shape_cast %66 : vector<4xf32> to vector<4x1xf32>
    %68 = vector.broadcast %67 : vector<4x1xf32> to vector<4x4xf32>
    %69 = arith.subf %65, %68 : vector<4x4xf32>
    %70 = math.exp %69 : vector<4x4xf32>
    %cst_28 = arith.constant dense<0.000000e+00> : vector<4xf32>
    %71 = vector.multi_reduction <add>, %70, %cst_28 [1] : vector<4x4xf32> to vector<4xf32>
    %72 = vector.shape_cast %71 : vector<4xf32> to vector<4x1xf32>
    %cst_29 = arith.constant 1.000000e+00 : f32
    %73 = vector.broadcast %cst_29 : f32 to vector<4x1xf32>
    %74 = arith.divf %73, %72 : vector<4x1xf32>
    %75 = vector.broadcast %74 : vector<4x1xf32> to vector<4x4xf32>
    %76 = arith.mulf %70, %75 : vector<4x4xf32>
    %77 = arith.truncf %76 : vector<4x4xf32> to vector<4x4xbf16>
    %cst_30 = arith.constant dense<0.000000e+00> : vector<4x16xf32>
    %78 = tpu.matmul %77, %61, %cst_30 {dimension_numbers = #tpu.dot_dimension_numbers<[1], [0], [0], [1], [0, 0, 1, 1], [], []>} : vector<4x4xbf16>, vector<4x16xbf16>, vector<4x16xf32> -> vector<4x16xf32>
    %79 = arith.truncf %78 : vector<4x16xf32> to vector<4x16xbf16>
    %c0_31 = arith.constant 0 : index
    %c0_32 = arith.constant 0 : index
    %c16 = arith.constant 16 : index
    %80 = vector.load %arg6[%c0_31, %c0_32, %c16] : memref<1x4x64xbf16, #tpu.memory_space<vmem>>, vector<1x4x16xbf16>
    %81 = vector.shape_cast %80 : vector<1x4x16xbf16> to vector<4x16xbf16>
    %82 = vector.shape_cast %79 : vector<4x16xbf16> to vector<1x4x16xbf16>
    tpu.vector_store %arg6[%c0_31, %c0_32, %c16], %82 {strides = array<i32>} : memref<1x4x64xbf16, #tpu.memory_space<vmem>>, vector<1x4x16xbf16>,
    %83 = vector.extract_strided_slice %28 {offsets = [0, 32], sizes = [4, 16], strides = [1, 1]} : vector<4x192xf32> to vector<4x16xf32>
    %84 = arith.truncf %83 : vector<4x16xf32> to vector<4x16xbf16>
    %85 = vector.extract_strided_slice %28 {offsets = [0, 96], sizes = [4, 16], strides = [1, 1]} : vector<4x192xf32> to vector<4x16xf32>
    %86 = arith.truncf %85 : vector<4x16xf32> to vector<4x16xbf16>
    %87 = vector.extract_strided_slice %28 {offsets = [0, 160], sizes = [4, 16], strides = [1, 1]} : vector<4x192xf32> to vector<4x16xf32>
    %88 = arith.truncf %87 : vector<4x16xf32> to vector<4x16xbf16>
    %cst_33 = arith.constant dense<0.000000e+00> : vector<4x4xf32>
    %89 = tpu.matmul %84, %86, %cst_33 {dimension_numbers = #tpu.dot_dimension_numbers<[1], [1], [0], [0], [0, 0, 1, 0], [], []>} : vector<4x16xbf16>, vector<4x16xbf16>, vector<4x4xf32> -> vector<4x4xf32>
    %c2 = arith.constant 2 : index
    %c0_34 = arith.constant 0 : index
    %c0_35 = arith.constant 0 : index
    %90 = vector.load %arg5[%c2, %c0_34, %c0_35] : memref<4x4x4xf32, #tpu.memory_space<vmem>>, vector<1x4x4xf32>
    %91 = vector.shape_cast %90 : vector<1x4x4xf32> to vector<4x4xf32>
    %92 = arith.addf %89, %91 : vector<4x4xf32>
    %cst_36 = arith.constant dense<0xFF800000> : vector<4xf32>
    %93 = vector.multi_reduction <maximumf>, %92, %cst_36 [1] : vector<4x4xf32> to vector<4xf32>
    %94 = vector.shape_cast %93 : vector<4xf32> to vector<4x1xf32>
    %95 = vector.broadcast %94 : vector<4x1xf32> to vector<4x4xf32>
    %96 = arith.subf %92, %95 : vector<4x4xf32>
    %97 = math.exp %96 : vector<4x4xf32>
    %cst_37 = arith.constant dense<0.000000e+00> : vector<4xf32>
    %98 = vector.multi_reduction <add>, %97, %cst_37 [1] : vector<4x4xf32> to vector<4xf32>
    %99 = vector.shape_cast %98 : vector<4xf32> to vector<4x1xf32>
    %cst_38 = arith.constant 1.000000e+00 : f32
    %100 = vector.broadcast %cst_38 : f32 to vector<4x1xf32>
    %101 = arith.divf %100, %99 : vector<4x1xf32>
    %102 = vector.broadcast %101 : vector<4x1xf32> to vector<4x4xf32>
    %103 = arith.mulf %97, %102 : vector<4x4xf32>
    %104 = arith.truncf %103 : vector<4x4xf32> to vector<4x4xbf16>
    %cst_39 = arith.constant dense<0.000000e+00> : vector<4x16xf32>
    %105 = tpu.matmul %104, %88, %cst_39 {dimension_numbers = #tpu.dot_dimension_numbers<[1], [0], [0], [1], [0, 0, 1, 1], [], []>} : vector<4x4xbf16>, vector<4x16xbf16>, vector<4x16xf32> -> vector<4x16xf32>
    %106 = arith.truncf %105 : vector<4x16xf32> to vector<4x16xbf16>
    %c0_40 = arith.constant 0 : index
    %c0_41 = arith.constant 0 : index
    %c32 = arith.constant 32 : index
    %107 = vector.load %arg6[%c0_40, %c0_41, %c32] : memref<1x4x64xbf16, #tpu.memory_space<vmem>>, vector<1x4x16xbf16>
    %108 = vector.shape_cast %107 : vector<1x4x16xbf16> to vector<4x16xbf16>
    %109 = vector.shape_cast %106 : vector<4x16xbf16> to vector<1x4x16xbf16>
    tpu.vector_store %arg6[%c0_40, %c0_41, %c32], %109 {strides = array<i32>} : memref<1x4x64xbf16, #tpu.memory_space<vmem>>, vector<1x4x16xbf16>,
    %110 = vector.extract_strided_slice %28 {offsets = [0, 48], sizes = [4, 16], strides = [1, 1]} : vector<4x192xf32> to vector<4x16xf32>
    %111 = arith.truncf %110 : vector<4x16xf32> to vector<4x16xbf16>
    %112 = vector.extract_strided_slice %28 {offsets = [0, 112], sizes = [4, 16], strides = [1, 1]} : vector<4x192xf32> to vector<4x16xf32>
    %113 = arith.truncf %112 : vector<4x16xf32> to vector<4x16xbf16>
    %114 = vector.extract_strided_slice %28 {offsets = [0, 176], sizes = [4, 16], strides = [1, 1]} : vector<4x192xf32> to vector<4x16xf32>
    %115 = arith.truncf %114 : vector<4x16xf32> to vector<4x16xbf16>
    %cst_42 = arith.constant dense<0.000000e+00> : vector<4x4xf32>
    %116 = tpu.matmul %111, %113, %cst_42 {dimension_numbers = #tpu.dot_dimension_numbers<[1], [1], [0], [0], [0, 0, 1, 0], [], []>} : vector<4x16xbf16>, vector<4x16xbf16>, vector<4x4xf32> -> vector<4x4xf32>
    %c3 = arith.constant 3 : index
    %c0_43 = arith.constant 0 : index
    %c0_44 = arith.constant 0 : index
    %117 = vector.load %arg5[%c3, %c0_43, %c0_44] : memref<4x4x4xf32, #tpu.memory_space<vmem>>, vector<1x4x4xf32>
    %118 = vector.shape_cast %117 : vector<1x4x4xf32> to vector<4x4xf32>
    %119 = arith.addf %116, %118 : vector<4x4xf32>
    %cst_45 = arith.constant dense<0xFF800000> : vector<4xf32>
    %120 = vector.multi_reduction <maximumf>, %119, %cst_45 [1] : vector<4x4xf32> to vector<4xf32>
    %121 = vector.shape_cast %120 : vector<4xf32> to vector<4x1xf32>
    %122 = vector.broadcast %121 : vector<4x1xf32> to vector<4x4xf32>
    %123 = arith.subf %119, %122 : vector<4x4xf32>
    %124 = math.exp %123 : vector<4x4xf32>
    %cst_46 = arith.constant dense<0.000000e+00> : vector<4xf32>
    %125 = vector.multi_reduction <add>, %124, %cst_46 [1] : vector<4x4xf32> to vector<4xf32>
    %126 = vector.shape_cast %125 : vector<4xf32> to vector<4x1xf32>
    %cst_47 = arith.constant 1.000000e+00 : f32
    %127 = vector.broadcast %cst_47 : f32 to vector<4x1xf32>
    %128 = arith.divf %127, %126 : vector<4x1xf32>
    %129 = vector.broadcast %128 : vector<4x1xf32> to vector<4x4xf32>
    %130 = arith.mulf %124, %129 : vector<4x4xf32>
    %131 = arith.truncf %130 : vector<4x4xf32> to vector<4x4xbf16>
    %cst_48 = arith.constant dense<0.000000e+00> : vector<4x16xf32>
    %132 = tpu.matmul %131, %115, %cst_48 {dimension_numbers = #tpu.dot_dimension_numbers<[1], [0], [0], [1], [0, 0, 1, 1], [], []>} : vector<4x4xbf16>, vector<4x16xbf16>, vector<4x16xf32> -> vector<4x16xf32>
    %133 = arith.truncf %132 : vector<4x16xf32> to vector<4x16xbf16>
    %c0_49 = arith.constant 0 : index
    %c0_50 = arith.constant 0 : index
    %c48 = arith.constant 48 : index
    %134 = vector.load %arg6[%c0_49, %c0_50, %c48] : memref<1x4x64xbf16, #tpu.memory_space<vmem>>, vector<1x4x16xbf16>
    %135 = vector.shape_cast %134 : vector<1x4x16xbf16> to vector<4x16xbf16>
    %136 = vector.shape_cast %133 : vector<4x16xbf16> to vector<1x4x16xbf16>
    tpu.vector_store %arg6[%c0_49, %c0_50, %c48], %136 {strides = array<i32>} : memref<1x4x64xbf16, #tpu.memory_space<vmem>>, vector<1x4x16xbf16>,
    return
  }
  func.func @transform_0(%arg0: i32) -> (i32, i32, i32) {
    %c0_i32 = arith.constant 0 : i32
    %c0_i32_0 = arith.constant 0 : i32
    %c0_i32_1 = arith.constant 0 : i32
    return %arg0, %c0_i32, %c0_i32_0 : i32, i32, i32
  }
  func.func @transform_1(%arg0: i32) -> (i32, i32) {
    %c0_i32 = arith.constant 0 : i32
    %c0_i32_0 = arith.constant 0 : i32
    %c0_i32_1 = arith.constant 0 : i32
    return %c0_i32, %c0_i32_0 : i32, i32
  }
  func.func @transform_2(%arg0: i32) -> (i32, i32) {
    %c0_i32 = arith.constant 0 : i32
    %c0_i32_0 = arith.constant 0 : i32
    %c0_i32_1 = arith.constant 0 : i32
    return %c0_i32, %c0_i32_0 : i32, i32
  }
  func.func @transform_3(%arg0: i32) -> (i32, i32) {
    %c0_i32 = arith.constant 0 : i32
    %c0_i32_0 = arith.constant 0 : i32
    %c0_i32_1 = arith.constant 0 : i32
    return %c0_i32, %c0_i32_0 : i32, i32
  }
  func.func @transform_4(%arg0: i32) -> (i32, i32, i32) {
    %c0_i32 = arith.constant 0 : i32
    %c0_i32_0 = arith.constant 0 : i32
    %c0_i32_1 = arith.constant 0 : i32
    %c0_i32_2 = arith.constant 0 : i32
    return %c0_i32, %c0_i32_0, %c0_i32_1 : i32, i32, i32
  }
  func.func @transform_5(%arg0: i32) -> (i32, i32, i32) {
    %c0_i32 = arith.constant 0 : i32
    %c0_i32_0 = arith.constant 0 : i32
    %c0_i32_1 = arith.constant 0 : i32
    return %arg0, %c0_i32, %c0_i32_0 : i32, i32, i32
  }
}

module attributes {stable_mosaic.version = 11 : i64} {
  func.func @kernel(%arg0: i32, %arg1: memref<8x64xbf16, #tpu.memory_space<vmem>>, %arg2: memref<8x64xf32, #tpu.memory_space<vmem>>, %arg3: memref<64x64xbf16, #tpu.memory_space<vmem>>, %arg4: memref<1x64xf32, #tpu.memory_space<vmem>>, %arg5: memref<1x64xf32, #tpu.memory_space<vmem>>, %arg6: memref<1x64xf32, #tpu.memory_space<vmem>>, %arg7: memref<64x256xbf16, #tpu.memory_space<vmem>>, %arg8: memref<1x256xf32, #tpu.memory_space<vmem>>, %arg9: memref<256x64xbf16, #tpu.memory_space<vmem>>, %arg10: memref<1x64xf32, #tpu.memory_space<vmem>>, %arg11: memref<1x64xf32, #tpu.memory_space<vmem>>, %arg12: memref<1x64xf32, #tpu.memory_space<vmem>>, %arg13: memref<8x64xf32, #tpu.memory_space<vmem>>) attributes {dimension_semantics = [#tpu.dimension_semantics<parallel>], iteration_bounds = array<i64: 1>, scalar_prefetch = 0 : i64, scratch_operands = 0 : i64, tpu.core_type = #tpu.core_type<tc>, window_params = [{transform_indices = @transform_0, window_bounds = array<i64: 8, 64>}, {transform_indices = @transform_1, window_bounds = array<i64: 8, 64>}, {pipeline_mode = #tpu.pipeline_mode<synchronous>, transform_indices = @transform_2, window_bounds = array<i64: 64, 64>}, {pipeline_mode = #tpu.pipeline_mode<synchronous>, transform_indices = @transform_3, window_bounds = array<i64: 1, 64>}, {pipeline_mode = #tpu.pipeline_mode<synchronous>, transform_indices = @transform_4, window_bounds = array<i64: 1, 64>}, {pipeline_mode = #tpu.pipeline_mode<synchronous>, transform_indices = @transform_5, window_bounds = array<i64: 1, 64>}, {pipeline_mode = #tpu.pipeline_mode<synchronous>, transform_indices = @transform_6, window_bounds = array<i64: 64, 256>}, {pipeline_mode = #tpu.pipeline_mode<synchronous>, transform_indices = @transform_7, window_bounds = array<i64: 1, 256>}, {pipeline_mode = #tpu.pipeline_mode<synchronous>, transform_indices = @transform_8, window_bounds = array<i64: 256, 64>}, {pipeline_mode = #tpu.pipeline_mode<synchronous>, transform_indices = @transform_9, window_bounds = array<i64: 1, 64>}, {pipeline_mode = #tpu.pipeline_mode<synchronous>, transform_indices = @transform_10, window_bounds = array<i64: 1, 64>}, {pipeline_mode = #tpu.pipeline_mode<synchronous>, transform_indices = @transform_11, window_bounds = array<i64: 1, 64>}, {transform_indices = @transform_12, window_bounds = array<i64: 8, 64>}]} {
    %c0 = arith.constant 0 : index
    %c0_0 = arith.constant 0 : index
    %0 = vector.load %arg1[%c0, %c0_0] : memref<8x64xbf16, #tpu.memory_space<vmem>>, vector<8x64xbf16>
    %c0_1 = arith.constant 0 : index
    %c0_2 = arith.constant 0 : index
    %1 = vector.load %arg2[%c0_1, %c0_2] : memref<8x64xf32, #tpu.memory_space<vmem>>, vector<8x64xf32>
    %c0_3 = arith.constant 0 : index
    %c0_4 = arith.constant 0 : index
    %2 = vector.load %arg3[%c0_3, %c0_4] : memref<64x64xbf16, #tpu.memory_space<vmem>>, vector<64x64xbf16>
    %c0_5 = arith.constant 0 : index
    %c0_6 = arith.constant 0 : index
    %3 = vector.load %arg4[%c0_5, %c0_6] : memref<1x64xf32, #tpu.memory_space<vmem>>, vector<1x64xf32>
    %c0_7 = arith.constant 0 : index
    %c0_8 = arith.constant 0 : index
    %4 = vector.load %arg5[%c0_7, %c0_8] : memref<1x64xf32, #tpu.memory_space<vmem>>, vector<1x64xf32>
    %c0_9 = arith.constant 0 : index
    %c0_10 = arith.constant 0 : index
    %5 = vector.load %arg6[%c0_9, %c0_10] : memref<1x64xf32, #tpu.memory_space<vmem>>, vector<1x64xf32>
    %c0_11 = arith.constant 0 : index
    %c0_12 = arith.constant 0 : index
    %6 = vector.load %arg7[%c0_11, %c0_12] : memref<64x256xbf16, #tpu.memory_space<vmem>>, vector<64x256xbf16>
    %c0_13 = arith.constant 0 : index
    %c0_14 = arith.constant 0 : index
    %7 = vector.load %arg8[%c0_13, %c0_14] : memref<1x256xf32, #tpu.memory_space<vmem>>, vector<1x256xf32>
    %c0_15 = arith.constant 0 : index
    %c0_16 = arith.constant 0 : index
    %8 = vector.load %arg9[%c0_15, %c0_16] : memref<256x64xbf16, #tpu.memory_space<vmem>>, vector<256x64xbf16>
    %c0_17 = arith.constant 0 : index
    %c0_18 = arith.constant 0 : index
    %9 = vector.load %arg10[%c0_17, %c0_18] : memref<1x64xf32, #tpu.memory_space<vmem>>, vector<1x64xf32>
    %c0_19 = arith.constant 0 : index
    %c0_20 = arith.constant 0 : index
    %10 = vector.load %arg11[%c0_19, %c0_20] : memref<1x64xf32, #tpu.memory_space<vmem>>, vector<1x64xf32>
    %c0_21 = arith.constant 0 : index
    %c0_22 = arith.constant 0 : index
    %11 = vector.load %arg12[%c0_21, %c0_22] : memref<1x64xf32, #tpu.memory_space<vmem>>, vector<1x64xf32>
    %cst = arith.constant dense<0.000000e+00> : vector<8x64xf32>
    %12 = tpu.matmul %0, %2, %cst {dimension_numbers = #tpu.dot_dimension_numbers<[1], [0], [0], [1], [0, 0, 1, 1], [], []>} : vector<8x64xbf16>, vector<64x64xbf16>, vector<8x64xf32> -> vector<8x64xf32>
    %13 = vector.broadcast %3 : vector<1x64xf32> to vector<8x64xf32>
    %14 = arith.addf %12, %13 : vector<8x64xf32>
    %15 = arith.addf %14, %1 : vector<8x64xf32>
    %cst_23 = arith.constant dense<0.000000e+00> : vector<8xf32>
    %16 = vector.multi_reduction <add>, %15, %cst_23 [1] : vector<8x64xf32> to vector<8xf32>
    %17 = vector.shape_cast %16 : vector<8xf32> to vector<8x1xf32>
    %cst_24 = arith.constant 6.400000e+01 : f32
    %18 = vector.broadcast %cst_24 : f32 to vector<8x1xf32>
    %19 = arith.divf %17, %18 : vector<8x1xf32>
    %20 = vector.broadcast %19 : vector<8x1xf32> to vector<8x64xf32>
    %21 = arith.subf %15, %20 : vector<8x64xf32>
    %22 = arith.mulf %21, %21 : vector<8x64xf32>
    %cst_25 = arith.constant dense<0.000000e+00> : vector<8xf32>
    %23 = vector.multi_reduction <add>, %22, %cst_25 [1] : vector<8x64xf32> to vector<8xf32>
    %24 = vector.shape_cast %23 : vector<8xf32> to vector<8x1xf32>
    %cst_26 = arith.constant 6.400000e+01 : f32
    %25 = vector.broadcast %cst_26 : f32 to vector<8x1xf32>
    %26 = arith.divf %24, %25 : vector<8x1xf32>
    %27 = vector.broadcast %19 : vector<8x1xf32> to vector<8x64xf32>
    %28 = arith.subf %15, %27 : vector<8x64xf32>
    %cst_27 = arith.constant 9.99999974E-6 : f32
    %29 = vector.broadcast %cst_27 : f32 to vector<8x1xf32>
    %30 = arith.addf %26, %29 : vector<8x1xf32>
    %31 = math.rsqrt %30 : vector<8x1xf32>
    %32 = vector.broadcast %31 : vector<8x1xf32> to vector<8x64xf32>
    %33 = arith.mulf %28, %32 : vector<8x64xf32>
    %34 = vector.broadcast %4 : vector<1x64xf32> to vector<8x64xf32>
    %35 = arith.mulf %33, %34 : vector<8x64xf32>
    %36 = vector.broadcast %5 : vector<1x64xf32> to vector<8x64xf32>
    %37 = arith.addf %35, %36 : vector<8x64xf32>
    %38 = arith.truncf %37 : vector<8x64xf32> to vector<8x64xbf16>
    %cst_28 = arith.constant dense<0.000000e+00> : vector<8x256xf32>
    %39 = tpu.matmul %38, %6, %cst_28 {dimension_numbers = #tpu.dot_dimension_numbers<[1], [0], [0], [1], [0, 0, 1, 1], [], []>} : vector<8x64xbf16>, vector<64x256xbf16>, vector<8x256xf32> -> vector<8x256xf32>
    %40 = vector.broadcast %7 : vector<1x256xf32> to vector<8x256xf32>
    %41 = arith.addf %39, %40 : vector<8x256xf32>
    %cst_29 = arith.constant 5.000000e-01 : f32
    %42 = vector.broadcast %cst_29 : f32 to vector<8x256xf32>
    %43 = arith.mulf %42, %41 : vector<8x256xf32>
    %cst_30 = arith.constant 0.707106769 : f32
    %44 = vector.broadcast %cst_30 : f32 to vector<8x256xf32>
    %45 = arith.mulf %41, %44 : vector<8x256xf32>
    %46 = math.erf %45 : vector<8x256xf32>
    %cst_31 = arith.constant 1.000000e+00 : f32
    %47 = vector.broadcast %cst_31 : f32 to vector<8x256xf32>
    %48 = arith.addf %47, %46 : vector<8x256xf32>
    %49 = arith.mulf %43, %48 : vector<8x256xf32>
    %50 = arith.truncf %49 : vector<8x256xf32> to vector<8x256xbf16>
    %cst_32 = arith.constant dense<0.000000e+00> : vector<8x64xf32>
    %51 = tpu.matmul %50, %8, %cst_32 {dimension_numbers = #tpu.dot_dimension_numbers<[1], [0], [0], [1], [0, 0, 1, 1], [], []>} : vector<8x256xbf16>, vector<256x64xbf16>, vector<8x64xf32> -> vector<8x64xf32>
    %52 = vector.broadcast %9 : vector<1x64xf32> to vector<8x64xf32>
    %53 = arith.addf %51, %52 : vector<8x64xf32>
    %54 = arith.addf %53, %15 : vector<8x64xf32>
    %cst_33 = arith.constant dense<0.000000e+00> : vector<8xf32>
    %55 = vector.multi_reduction <add>, %54, %cst_33 [1] : vector<8x64xf32> to vector<8xf32>
    %56 = vector.shape_cast %55 : vector<8xf32> to vector<8x1xf32>
    %cst_34 = arith.constant 6.400000e+01 : f32
    %57 = vector.broadcast %cst_34 : f32 to vector<8x1xf32>
    %58 = arith.divf %56, %57 : vector<8x1xf32>
    %59 = vector.broadcast %58 : vector<8x1xf32> to vector<8x64xf32>
    %60 = arith.subf %54, %59 : vector<8x64xf32>
    %61 = arith.mulf %60, %60 : vector<8x64xf32>
    %cst_35 = arith.constant dense<0.000000e+00> : vector<8xf32>
    %62 = vector.multi_reduction <add>, %61, %cst_35 [1] : vector<8x64xf32> to vector<8xf32>
    %63 = vector.shape_cast %62 : vector<8xf32> to vector<8x1xf32>
    %cst_36 = arith.constant 6.400000e+01 : f32
    %64 = vector.broadcast %cst_36 : f32 to vector<8x1xf32>
    %65 = arith.divf %63, %64 : vector<8x1xf32>
    %66 = vector.broadcast %58 : vector<8x1xf32> to vector<8x64xf32>
    %67 = arith.subf %54, %66 : vector<8x64xf32>
    %cst_37 = arith.constant 9.99999974E-6 : f32
    %68 = vector.broadcast %cst_37 : f32 to vector<8x1xf32>
    %69 = arith.addf %65, %68 : vector<8x1xf32>
    %70 = math.rsqrt %69 : vector<8x1xf32>
    %71 = vector.broadcast %70 : vector<8x1xf32> to vector<8x64xf32>
    %72 = arith.mulf %67, %71 : vector<8x64xf32>
    %73 = vector.broadcast %10 : vector<1x64xf32> to vector<8x64xf32>
    %74 = arith.mulf %72, %73 : vector<8x64xf32>
    %75 = vector.broadcast %11 : vector<1x64xf32> to vector<8x64xf32>
    %76 = arith.addf %74, %75 : vector<8x64xf32>
    %c0_38 = arith.constant 0 : index
    %c0_39 = arith.constant 0 : index
    %77 = vector.load %arg13[%c0_38, %c0_39] : memref<8x64xf32, #tpu.memory_space<vmem>>, vector<8x64xf32>
    tpu.vector_store %arg13[%c0_38, %c0_39], %76 {strides = array<i32>} : memref<8x64xf32, #tpu.memory_space<vmem>>, vector<8x64xf32>,
    return
  }
  func.func @transform_0(%arg0: i32) -> (i32, i32) {
    %c0_i32 = arith.constant 0 : i32
    %c0_i32_0 = arith.constant 0 : i32
    return %arg0, %c0_i32 : i32, i32
  }
  func.func @transform_1(%arg0: i32) -> (i32, i32) {
    %c0_i32 = arith.constant 0 : i32
    %c0_i32_0 = arith.constant 0 : i32
    return %arg0, %c0_i32 : i32, i32
  }
  func.func @transform_2(%arg0: i32) -> (i32, i32) {
    %c0_i32 = arith.constant 0 : i32
    %c0_i32_0 = arith.constant 0 : i32
    %c0_i32_1 = arith.constant 0 : i32
    return %c0_i32, %c0_i32_0 : i32, i32
  }
  func.func @transform_3(%arg0: i32) -> (i32, i32) {
    %c0_i32 = arith.constant 0 : i32
    %c0_i32_0 = arith.constant 0 : i32
    %c0_i32_1 = arith.constant 0 : i32
    return %c0_i32, %c0_i32_0 : i32, i32
  }
  func.func @transform_4(%arg0: i32) -> (i32, i32) {
    %c0_i32 = arith.constant 0 : i32
    %c0_i32_0 = arith.constant 0 : i32
    %c0_i32_1 = arith.constant 0 : i32
    return %c0_i32, %c0_i32_0 : i32, i32
  }
  func.func @transform_5(%arg0: i32) -> (i32, i32) {
    %c0_i32 = arith.constant 0 : i32
    %c0_i32_0 = arith.constant 0 : i32
    %c0_i32_1 = arith.constant 0 : i32
    return %c0_i32, %c0_i32_0 : i32, i32
  }
  func.func @transform_6(%arg0: i32) -> (i32, i32) {
    %c0_i32 = arith.constant 0 : i32
    %c0_i32_0 = arith.constant 0 : i32
    %c0_i32_1 = arith.constant 0 : i32
    return %c0_i32, %c0_i32_0 : i32, i32
  }
  func.func @transform_7(%arg0: i32) -> (i32, i32) {
    %c0_i32 = arith.constant 0 : i32
    %c0_i32_0 = arith.constant 0 : i32
    %c0_i32_1 = arith.constant 0 : i32
    return %c0_i32, %c0_i32_0 : i32, i32
  }
  func.func @transform_8(%arg0: i32) -> (i32, i32) {
    %c0_i32 = arith.constant 0 : i32
    %c0_i32_0 = arith.constant 0 : i32
    %c0_i32_1 = arith.constant 0 : i32
    return %c0_i32, %c0_i32_0 : i32, i32
  }
  func.func @transform_9(%arg0: i32) -> (i32, i32) {
    %c0_i32 = arith.constant 0 : i32
    %c0_i32_0 = arith.constant 0 : i32
    %c0_i32_1 = arith.constant 0 : i32
    return %c0_i32, %c0_i32_0 : i32, i32
  }
  func.func @transform_10(%arg0: i32) -> (i32, i32) {
    %c0_i32 = arith.constant 0 : i32
    %c0_i32_0 = arith.constant 0 : i32
    %c0_i32_1 = arith.constant 0 : i32
    return %c0_i32, %c0_i32_0 : i32, i32
  }
  func.func @transform_11(%arg0: i32) -> (i32, i32) {
    %c0_i32 = arith.constant 0 : i32
    %c0_i32_0 = arith.constant 0 : i32
    %c0_i32_1 = arith.constant 0 : i32
    return %c0_i32, %c0_i32_0 : i32, i32
  }
  func.func @transform_12(%arg0: i32) -> (i32, i32) {
    %c0_i32 = arith.constant 0 : i32
    %c0_i32_0 = arith.constant 0 : i32
    return %arg0, %c0_i32 : i32, i32
  }
}

</mosaic_0001>

<bundles_post_ra>
// kernel: vit_forward.5
= control target key start
LH: loop header
LB: loop body
LE: loop exit
PB: predicated region body
PF: predicated region fallthrough
CT: control target
= control target key end

     0   :  { %vm198_vm0 = vcmask 523264   ;;  %s340_s1 = inlined_call_operand.vmem [shape: bf16[256,64], index: 1, kind: input, shape index: {}]   ;;  %s341_s0 = inlined_call_operand.vmem [shape: bf16[8,256], index: 0, kind: input, shape index: {}]   ;;  %s342_s2 = inlined_call_operand.vmem [shape: f32[1,64], index: 2, kind: input, shape index: {}]   ;;  %s343_s3 = inlined_call_operand.vmem [shape: f32[8,64], index: 3, kind: output, shape index: {}]  }
   0x1   :  { %v245_v0 = vld [vmem:[%s340_s1 + $0x40] sm:$0xff]   ;;  %v247_v2 = vld [vmem:[%s340_s1 + $0x48] sm:$0xff]   ;;  %v249_v4 = vld [vmem:[%s340_s1 + $0x50] sm:$0xff]  }
   0x2   :  { %v246_v1 = vld [vmem:[%s340_s1] sm:$0xff]   ;;  %223 = vmatprep.subr.bf16.mxu0 %v245_v0  ;;  %v248_v3 = vld [vmem:[%s340_s1 + $0x8] sm:$0xff]   ;;  %v250_v5 = vld [vmem:[%s340_s1 + $0x10] sm:$0xff]  }
   0x3   :  { %224 = vmatpush3.bf16.msra.mxu0 %v246_v1  ;;  %v251_v6 = vld [vmem:[%s340_s1 + $0x58] sm:$0xff]   ;;  %v253_v8 = vld [vmem:[%s340_s1 + $0x60] sm:$0xff]   ;;  %v255_v10 = vld [vmem:[%s340_s1 + $0x68] sm:$0xff]  }
   0x4   :  { %225 = vmatprep.subr.bf16.mxu0 %v247_v2  ;;  %v252_v7 = vld [vmem:[%s340_s1 + $0x18] sm:$0xff]   ;;  %v254_v9 = vld [vmem:[%s340_s1 + $0x20] sm:$0xff]   ;;  %v256_v13 = vld [vmem:[%s340_s1 + $0x28] sm:$0xff]  }
   0x5   :  { %v15_v11 = vld [vmem:[%s341_s0] sm:$0xff]  ;;  %v257_v14 = vld [vmem:[%s340_s1 + $0x70] sm:$0xff]   ;;  %v259_v16 = vld [vmem:[%s340_s1 + $0x78] sm:$0xff]  }
   0x6   :  { %v206_v12 = vcombine.high %v15_v11, %v15_v11  ;;  %v258_v15 = vld [vmem:[%s340_s1 + $0x30] sm:$0xff]   ;;  %v260_v17 = vld [vmem:[%s340_s1 + $0x38] sm:$0xff]   ;;  %v205_v18 = vcombine.low %v15_v11, %v15_v11  ;;  %v204_v20 = vld [vmem:[%s342_s2] ss:$0 sm:$0xff] }
   0x7   :  { %226 = vmatpush3.bf16.msra.mxu0 %v248_v3 }
   0x8   :  { %227 = vmatprep.subr.bf16.mxu0 %v249_v4  ;;  %190 = vmatprep.mubr.bf16.mxu0 %v206_v12 }
   0xb   :  { %228 = vmatpush3.bf16.msra.mxu0 %v250_v5 }
   0xc   :  { %229 = vmatprep.subr.bf16.mxu0 %v251_v6 }
   0xf   :  { %230 = vmatpush3.bf16.msra.mxu0 %v252_v7 }
  0x10   :  { %231 = vmatprep.subr.bf16.mxu0 %v253_v8 }
  0x13   :  { %232 = vmatpush3.bf16.msra.mxu0 %v254_v9 }
  0x14   :  { %233 = vmatprep.subr.bf16.mxu0 %v255_v10 }
  0x17   :  { %234 = vmatpush3.bf16.msra.mxu0 %v256_v13 }
  0x18   :  { %235 = vmatprep.subr.bf16.mxu0 %v257_v14 }
  0x1b   :  { %236 = vmatpush3.bf16.msra.mxu0 %v258_v15 }
  0x1c   :  { %237 = vmatprep.subr.bf16.mxu0 %v259_v16 }
  0x1f   :  { %238 = vmatpush3.bf16.msra.mxu0 %v260_v17 }
  0x22   :  { %191 = vmatmul.mubr.bf16.vlgmr.msra.gmra.mrb[0].mxu0 %v205_v18 }
  0xf5   :  { %v239_v19 = vpop.f32.mrb[0].mxu0 }
  0xf6   :  { %v240_v21 = vpop.f32.mrb[1].mxu0 }
  0xf7   :  { %v241_v22 = vadd.f32 %v240_v21, %v239_v19  ;;  %v242_v23 = vpop.f32.mrb[2].mxu0 }
  0xf8   :  { %v243_v24 = vpop.f32.mrb[3].mxu0 }
  0xf9   :  { %v193_v25 = vadd.f32 %v241_v22, %v204_v20 }
  0xfb   :  { %199 = vst.msk [vmem:[%s343_s3] sm:$0xff] %vm198_vm0, %v193_v25 }

// kernel: vit_forward.7
= control target key start
LH: loop header
LB: loop body
LE: loop exit
PB: predicated region body
PF: predicated region fallthrough
CT: control target
= control target key end

     0   :  { %v564_v0 = vmov 0.0   ;;  %vm565_vm0 = vmmov 0   ;;  %vm121_vm1 = vcmask 523264   ;;  %v566_v28 = vmov 0   ;;  %s740_s2 = inlined_call_operand.vmem [shape: bf16[64,64], index: 2, kind: input, shape index: {}]   ;;  %s741_s0 = inlined_call_operand.vmem [shape: bf16[8,64], index: 0, kind: input, shape index: {}]   ;;  %s742_s3 = inlined_call_operand.vmem [shape: f32[1,64], index: 3, kind: input, shape index: {}]   ;;  %s743_s1 = inlined_call_operand.vmem [shape: f32[8,64], index: 1, kind: input, shape index: {}]   ;;  %s744_s6 = inlined_call_operand.vmem [shape: bf16[64,256], index: 6, kind: input, shape index: {}]   ;;  %s745_s8 = inlined_call_operand.vmem [shape: bf16[256,64], index: 8, kind: input, shape index: {}]   ;;  %s746_s4 = inlined_call_operand.vmem [shape: f32[1,64], index: 4, kind: input, shape index: {}]   ;;  %s747_s5 = inlined_call_operand.vmem [shape: f32[1,64], index: 5, kind: input, shape index: {}]   ;;  %s748_s7 = inlined_call_operand.vmem [shape: f32[1,256], index: 7, kind: input, shape index: {}]   ;;  %s749_s9 = inlined_call_operand.vmem [shape: f32[1,64], index: 9, kind: input, shape index: {}]   ;;  %s750_s10 = inlined_call_operand.vmem [shape: f32[8,64], index: 10, kind: output, shape index: {}]  }
   0x1   :  { %511 = vmatprep.subr.bf16.mxu1 %v564_v0  ;;  %v526_v1 = vld [vmem:[%s740_s2] sm:$0xff]   ;;  %519 = vmatprep.mubr.msk.bf16.mxu1 %vm565_vm0, %v564_v0  ;;  %v527_v2 = vld [vmem:[%s740_s2 + $0x8] sm:$0xff]   ;;  %v528_v3 = vld [vmem:[%s740_s2 + $0x10] sm:$0xff]   ;;  %v196_v55 = vlaneseq }
   0x2   :  { %512 = vmatpush3.bf16.msra.mxu1 %v526_v1  ;;  %v529_v4 = vld [vmem:[%s740_s2 + $0x18] sm:$0xff]   ;;  %v36_v5 = vld [vmem:[%s741_s0] sm:$0xf]  ;;  %v532_v20 = vld [vmem:[%s744_s6 + $0x4] ss:$8 sps:$4 sm:$0xff]  }
   0x3   :  { %513 = vmatprep.subr.bf16.mxu1 %v564_v0  ;;  %v450_v6 = vld [vmem:[%s742_s3] ss:$0 sm:$0xff]  ;;  %v535_v22 = vld [vmem:[%s744_s6 + $0x14] ss:$8 sps:$4 sm:$0xff]   ;;  %v533_v23 = vld [vmem:[%s744_s6 + $0x10] ss:$8 sps:$4 sm:$0xff]  }
   0x4   :  { %v37_v7 = vld [vmem:[%s743_s1] sm:$0xff]  ;;  %v539_v26 = vld [vmem:[%s744_s6 + $0x30] ss:$8 sps:$4 sm:$0xff]   ;;  %v541_v27 = vld [vmem:[%s744_s6 + $0x34] ss:$8 sps:$4 sm:$0xff]   ;;  %v197_v56 = vshrl.u32 %v196_v55, 7 }
   0x5   :  { %v530_v21 = vld [vmem:[%s744_s6] ss:$8 sps:$4 sm:$0xff]   ;;  %v538_v24 = vld [vmem:[%s744_s6 + $0x24] ss:$8 sps:$4 sm:$0xff]   ;;  %v546_v43 = vld [vmem:[%s745_s8 + $0x50] sm:$0xff]  }
   0x6   :  { %514 = vmatpush3.bf16.msra.mxu1 %v527_v2  ;;  %v536_v25 = vld [vmem:[%s744_s6 + $0x20] ss:$8 sps:$4 sm:$0xff]   ;;  %v547_v44 = vld [vmem:[%s745_s8 + $0x10] sm:$0xff]   ;;  %v548_v45 = vld [vmem:[%s745_s8 + $0x58] sm:$0xff]   ;;  %v198_v57 = vsub.s32 0, %v197_v56  ;;  %v202_v59 = vsub.s32 1, %v197_v56 }
   0x7   :  { %515 = vmatprep.subr.bf16.mxu1 %v564_v0  ;;  %v542_v29 = vld [vmem:[%s745_s8 + $0x40] sm:$0xff]   ;;  %v544_v31 = vld [vmem:[%s745_s8 + $0x48] sm:$0xff]   ;;  %v549_v46 = vld [vmem:[%s745_s8 + $0x18] sm:$0xff]  }
   0x8   :  { %v543_v30 = vld [vmem:[%s745_s8] sm:$0xff]   ;;  %489 = vmatprep.subr.bf16.mxu0 %v542_v29  ;;  %v545_v32 = vld [vmem:[%s745_s8 + $0x8] sm:$0xff]   ;;  %v554_v51 = vld [vmem:[%s745_s8 + $0x70] sm:$0xff]  }
   0x9   :  { %490 = vmatpush3.bf16.msra.mxu0 %v543_v30  ;;  %v456_v37 = vld [vmem:[%s746_s4] ss:$0 sm:$0xff]  ;;  %v552_v49 = vld [vmem:[%s745_s8 + $0x68] sm:$0xff]   ;;  %v555_v52 = vld [vmem:[%s745_s8 + $0x30] sm:$0xff]  }
   0xa   :  { %516 = vmatpush3.bf16.msra.mxu1 %v528_v3  ;;  %491 = vmatprep.subr.bf16.mxu0 %v544_v31  ;;  %v457_v39 = vld [vmem:[%s747_s5] ss:$0 sm:$0xff]  ;;  %v553_v50 = vld [vmem:[%s745_s8 + $0x28] sm:$0xff]   ;;  %v556_v53 = vld [vmem:[%s745_s8 + $0x78] sm:$0xff]  }
   0xb   :  { %517 = vmatprep.subr.bf16.mxu1 %v564_v0  ;;  %v550_v47 = vld [vmem:[%s745_s8 + $0x60] sm:$0xff]   ;;  %v557_v54 = vld [vmem:[%s745_s8 + $0x38] sm:$0xff]  }
   0xc   :  { %v551_v48 = vld [vmem:[%s745_s8 + $0x20] sm:$0xff]  }
   0xd   :  { %492 = vmatpush3.bf16.msra.mxu0 %v545_v32  ;;  %v57_v58 = vld [vmem:[%s748_s7] sm:$0x3] }
   0xe   :  { %518 = vmatpush3.bf16.msra.mxu1 %v529_v4  ;;  %493 = vmatprep.subr.bf16.mxu0 %v546_v43  ;;  %v199_v60 = vrot.slane %v57_v58, %v198_v57  ;;  %v203_v61 = vrot.slane %v57_v58, %v202_v59 }
   0xf   :  { %249 = vmatprep.subr.bf16.mxu1 %v532_v20 }
  0x11   :  { %520 = vmatmul.mubr.msk.bf16.vlgmr.msra.gmra.mrb[0].mxu1 %vm121_vm1, %v36_v5  ;;  %494 = vmatpush3.bf16.msra.mxu0 %v547_v44 }
  0x12   :  { %250 = vmatpush1.bf16.msra.mxu1 %v530_v21  ;;  %281 = vmatprep.mubr.bf16.mxu1 %v566_v28 }
  0x13   :  { %251 = vmatprep.subr.bf16.mxu1 %v535_v22  ;;  %495 = vmatprep.subr.bf16.mxu0 %v548_v45 }
  0x15   :  { %496 = vmatpush3.bf16.msra.mxu0 %v549_v46 }
  0x16   :  { %252 = vmatpush1.bf16.msra.mxu1 %v533_v23  ;;  %497 = vmatprep.subr.bf16.mxu0 %v550_v47 }
  0x17   :  { %253 = vmatprep.subr.bf16.mxu1 %v538_v24 }
  0x19   :  { %498 = vmatpush3.bf16.msra.mxu0 %v551_v48 }
  0x1a   :  { %254 = vmatpush1.bf16.msra.mxu1 %v536_v25  ;;  %499 = vmatprep.subr.bf16.mxu0 %v552_v49 }
  0x1b   :  { %255 = vmatprep.subr.bf16.mxu1 %v541_v27 }
  0x1d   :  { %500 = vmatpush3.bf16.msra.mxu0 %v553_v50 }
  0x1e   :  { %256 = vmatpush1.bf16.msra.mxu1 %v539_v26  ;;  %501 = vmatprep.subr.bf16.mxu0 %v554_v51 }
  0x21   :  { %502 = vmatpush3.bf16.msra.mxu0 %v555_v52 }
  0x22   :  { %503 = vmatprep.subr.bf16.mxu0 %v556_v53 }
  0x25   :  { %504 = vmatpush3.bf16.msra.mxu0 %v557_v54 }
  0xe4   :  { %v159_v8 = vpop.f32.mrb[0].mxu1 }
  0xe5   :  { %v160_v9 = vadd.f32 %v450_v6, %v159_v8  ;;  %v521_v10 = vpop.f32.mrb[1].mxu1 }
  0xe6   :  { %v162_v11 = vpop.f32.mrb[2].mxu1 }
  0xe7   :  { %v644_v12 = vadd.f32 %v160_v9, %v37_v7  ;;  %v522_v13 = vpop.f32.mrb[3].mxu1 }
  0xe9   :  { %v166_v14 = vsel %vm121_vm1, %v644_v12, 0.0 }
  0xea   :  { %167 = vadd.xlane.f32.xlu0 %v166_v14 }
 0x177   :  { %v168_v15 = vpop.xlane.xlu0 %167 }
 0x178   :  { %v170_v16 = vmul.f32 0.015625, %v168_v15 }
 0x17a   :  { %v171_v17 = vsub.f32 %v644_v12, %v170_v16 }
 0x17c   :  { %v172_v18 = vmul.f32 %v171_v17, %v171_v17 }
 0x17e   :  { %v173_v19 = vsel %vm121_vm1, %v172_v18, 0.0  ;;  %v467_v18 = vld [vmem:[%s749_s9] ss:$0 sm:$0xff] }
 0x17f   :  { %174 = vadd.xlane.f32.xlu0 %v173_v19 }
 0x20c   :  { %v175_v33 = vpop.xlane.xlu0 %174 }
 0x20d   :  { %v176_v34 = vmul.f32 0.015625, %v175_v33 }
 0x20f   :  { %v177_v35 = vadd.f32 1e-05, %v176_v34 }
 0x211   :  { %558 = vrsqrt.f32 %v177_v35 }
 0x21b   :  { %v559_v36 = vpop.eup %558 }
 0x21c   :  { %v179_v38 = vmul.f32 %v559_v36, %v171_v17 }
 0x21e   :  { %v186_v40 = vmul.f32 %v456_v37, %v179_v38 }
 0x220   :  { %v193_v41 = vadd.f32 %v457_v39, %v186_v40 }
 0x222   :  { %v194_v42 = vpack.c.bf16 %v193_v41, %v193_v41 }
 0x224   :  { %466 = vmatmul.mubr.msk.bf16.vlgmr.msra.gmra.mrb[4].mxu1 %vm121_vm1, %v194_v42 }
 0x2f7   :  { %v283_v62 = vpop.f32.mrb[4].mxu1 }
 0x2f8   :  { %v284_v63 = vadd.f32 %v283_v62, %v199_v60  ;;  %v285_v0 = vpop.f32.mrb[5].mxu1 }
 0x2f9   :  { %v286_v1 = vadd.f32 %v285_v0, %v203_v61  ;;  %v287_v2 = vpop.f32.mrb[6].mxu1 }
 0x2fa   :  { %v292_v3 = vmul.f32 0.70710677, %v284_v63  ;;  %v288_v4 = vpop.f32.mrb[7].mxu1  ;;  %v290_v8 = vmul.f32 0.5, %v284_v63 }
 0x2fb   :  { %v293_v5 = vmul.f32 0.70710677, %v286_v1  ;;  %v291_v10 = vmul.f32 0.5, %v286_v1 }
 0x2fc   :  { %560 = verf.f32 %v292_v3 }
 0x2fd   :  { %562 = verf.f32 %v293_v5 }
 0x306   :  { %v561_v6 = vpop.eup %560 }
 0x307   :  { %v563_v7 = vpop.eup %562  ;;  %v296_v9 = vadd.f32 1.0, %v561_v6 }
 0x308   :  { %v297_v11 = vadd.f32 1.0, %v563_v7 }
 0x309   :  { %v298_v13 = vmul.f32 %v296_v9, %v290_v8 }
 0x30a   :  { %v299_v14 = vmul.f32 %v297_v11, %v291_v10 }
 0x30b   :  { %v300_v16 = vpack.c.bf16 %v298_v13, %v298_v13 }
 0x30c   :  { %v301_v15 = vpack.c.bf16 %v299_v14, %v299_v14 }
 0x30e   :  { %436 = vmatprep.mubr.bf16.mxu0 %v301_v15 }
 0x30f   :  { %437 = vmatmul.mubr.bf16.vlgmr.msra.gmra.mrb[0].mxu0 %v300_v16 }
 0x3e2   :  { %v505_v17 = vpop.f32.mrb[0].mxu0 }
 0x3e3   :  { %v506_v19 = vpop.f32.mrb[1].mxu0 }
 0x3e4   :  { %v507_v20 = vadd.f32 %v506_v19, %v505_v17  ;;  %v508_v21 = vpop.f32.mrb[2].mxu0 }
 0x3e5   :  { %v509_v22 = vpop.f32.mrb[3].mxu0 }
 0x3e6   :  { %v439_v23 = vadd.f32 %v507_v20, %v467_v18 }
 0x3e8   :  { %v444_v24 = vadd.f32 %v439_v23, %v644_v12 }
 0x3ea   :  { %445 = vst.msk [vmem:[%s750_s10] sm:$0xff] %vm121_vm1, %v444_v24 }

// kernel: vit_forward.6
= control target key start
LH: loop header
LB: loop body
LE: loop exit
PB: predicated region body
PF: predicated region fallthrough
CT: control target
= control target key end

     0   :  { %s1093_s18 = smov 0   ;;  %s1228_s0 = inlined_call_operand.vmem [shape: f32[2,4,64], index: 0, kind: input, shape index: {}]   ;;  %s1229_s1 = inlined_call_operand.vmem [shape: f32[1,64], index: 1, kind: input, shape index: {}]   ;;  %s1230_s2 = inlined_call_operand.vmem [shape: f32[1,64], index: 2, kind: input, shape index: {}]   ;;  %s1231_s3 = inlined_call_operand.vmem [shape: bf16[64,192], index: 3, kind: input, shape index: {}]   ;;  %s1232_s4 = inlined_call_operand.vmem [shape: f32[4,4,4], index: 4, kind: input, shape index: {}]   ;;  %s1233_s5 = inlined_call_operand.vmem [shape: bf16[2,4,64], index: 5, kind: output, shape index: {}]  }
   0x1 LB: > { %s900_s19 = sadd.s32 4294967295, %s1050_s18   ;;  %p904_p0 = scmp.ge.s32.totalorder %s1050_s18, 1  ;;  %s1050_s18 = sphi %s1093_s18, %s15_s18  }
   0x2   : > { %p186_p1 = scmp.lt.s32.totalorder %s1050_s18, 3 }
   0x4   : > { %p187_p2 = pnand %p904_p0, %p186_p1 }
   0x5   : > { %p212_p3 = scmp.lt.s32.totalorder (!%p187_p2), %s900_s19, 1  ;;  %vm224_vm0 = vcmask (!%p187_p2), 519168   ;;  %v1014_v7 = vld [vmem:[%s1231_s3 + $0x4] ss:$8 sps:$4 sm:$0xff] (!%p187_p2)   ;;  %v1016_v8 = vld [vmem:[%s1231_s3] ss:$8 sps:$4 sm:$0xff] (!%p187_p2)  }
   0x6   : > { %190 = sbr.rel (%p187_p2) target bundleno = 1592 (0x638), region = 40  ;;  %v1017_v9 = vld [vmem:[%s1231_s3 + $0x14] ss:$8 sps:$4 sm:$0xff] (!%p187_p2)   ;;  %306 = vmatprep.subr.bf16.mxu0 (!%p187_p2), %v1014_v7  ;;  %v1019_v10 = vld [vmem:[%s1231_s3 + $0x10] ss:$8 sps:$4 sm:$0xff] (!%p187_p2)   ;;  %v1052_v11 = vmov (!%p187_p2), 0  }
   0x7   : > { %307 = vmatpush1.bf16.msra.mxu0 (!%p187_p2), %v1016_v8  ;;  %338 = vmatprep.mubr.bf16.mxu0 (!%p187_p2), %v1052_v11  ;;  %v1020_v12 = vld [vmem:[%s1231_s3 + $0x24] ss:$8 sps:$4 sm:$0xff] (!%p187_p2)   ;;  %v1022_v13 = vld [vmem:[%s1231_s3 + $0x20] ss:$8 sps:$4 sm:$0xff] (!%p187_p2)   ;;  %v1023_v14 = vld [vmem:[%s1231_s3 + $0x34] ss:$8 sps:$4 sm:$0xff] (!%p187_p2)  }
   0x8   : > { %308 = vmatprep.subr.bf16.mxu0 (!%p187_p2), %v1017_v9  ;;  %v1025_v15 = vld [vmem:[%s1231_s3 + $0x30] ss:$8 sps:$4 sm:$0xff] (!%p187_p2)   ;;  %v907_v20 = vld [vmem:[%s1229_s1] ss:$0 sm:$0xff] (!%p187_p2)  ;;  %vm302_vm1 = vcmask (!%p187_p2), 523264   ;;  %v1053_v26 = vmov (!%p187_p2), 0.0  }
   0x9   : > { %v908_v22 = vld [vmem:[%s1230_s2] ss:$0 sm:$0xff] (!%p187_p2)  ;;  %947 = vmatprep.subr.bf16.mxu1 (!%p187_p2), %v1053_v26  ;;  %vm1054_vm2 = vmmov (!%p187_p2), 0   ;;  %s1055_s21 = smov (!%p187_p2), 112   ;;  %s1056_s22 = smov (!%p187_p2), 64   ;;  %vm353_vm3 = vcmask (!%p187_p2), 130048  }
   0xa   : > { %949 = vmatprep.mubr.msk.bf16.mxu1 (!%p187_p2), %vm1054_vm2, %v1053_v26  ;;  %s1058_s24 = smov (!%p187_p2), 32   ;;  %s1059_s25 = smov (!%p187_p2), 96   ;;  %vm418_vm4 = vcmask (!%p187_p2), 1041408   ;;  %v349_v45 = vld [vmem:[%s1232_s4] sm:$0xf] (!%p187_p2)  ;;  %vm400_vm5 = vcmask (!%p187_p2), 27648  }
   0xb   : > { %309 = vmatpush1.bf16.msra.mxu0 (!%p187_p2), %v1019_v10  ;;  %s1060_s26 = smov (!%p187_p2), 16   ;;  %s1061_s27 = smov (!%p187_p2), 80   ;;  %v920_v50 = vld [vmem:[%s1232_s4 + $0x4] sm:$0xf] (!%p187_p2)  ;;  %v923_v59 = vld [vmem:[%s1232_s4 + $0x8] sm:$0xf] (!%p187_p2) }
   0xc   : > { %310 = vmatprep.subr.bf16.mxu0 (!%p187_p2), %v1020_v12  ;;  %vm414_vm6 = vcmask (!%p187_p2), 31744   ;;  %vm463_vm7 = vcmask (!%p187_p2), 123904   ;;  %vm591_vm8 = vcmask (!%p187_p2), 255104   ;;  %vm718_vm9 = vcmask (!%p187_p2), 386304  }
   0xd   : > { %s1235_s19 = smov (!%p212_p3, %s900_s19), 1  ;;  %vm845_vm10 = vcmask 517504  }
   0xe   : > { %s905_s20 = sshll.u32 %s1235_s19, 2  ;;  %s906_s11 = sshll.u32 %s1235_s19, 1 }
   0xf   : > { %s215_s23 = scalar_lea.vmem %s1228_s0, %s905_s20  ;;  %311 = vmatpush1.bf16.msra.mxu0 %v1022_v13  ;;  %s1216_s14 = scalar_lea.vmem %s1233_s5, %s906_s11 }
  0x10   : > { %v221_v0 = vld [vmem:[%s215_s23] sm:$0xf]  ;;  %312 = vmatprep.subr.bf16.mxu0 %v1023_v14  ;;  %s1057_s23 = smov 48  }
  0x11   : > { %v225_v1 = vsel %vm224_vm0, %v221_v0, 0.0 }
  0x12   : > { %226 = vadd.xlane.f32.xlu0 %v225_v1 }
  0x13   : > { %313 = vmatpush1.bf16.msra.mxu0 %v1025_v15 }
  0x14   : > { %959 = vmatprep.subr.bf16.mxu0 %v1053_v26 }
  0x9f   : > { %v227_v2 = vpop.xlane.xlu0 %226 }
  0xa0   : > { %v229_v3 = vmul.f32 0.015625, %v227_v2  ;;  %v926_v2 = vld [vmem:[%s1232_s4 + $0xc] sm:$0xf] }
  0xa2   : > { %v230_v4 = vsub.f32 %v221_v0, %v229_v3 }
  0xa4   : > { %v231_v5 = vmul.f32 %v230_v4, %v230_v4 }
  0xa6   : > { %v232_v6 = vsel %vm224_vm0, %v231_v5, 0.0 }
  0xa7   : > { %233 = vadd.xlane.f32.xlu0 %v232_v6 }
 0x134   : > { %v234_v16 = vpop.xlane.xlu0 %233 }
 0x135   : > { %v235_v17 = vmul.f32 0.015625, %v234_v16 }
 0x137   : > { %v236_v18 = vadd.f32 1e-05, %v235_v17 }
 0x139   : > { %1026 = vrsqrt.f32 %v236_v18 }
 0x143   : > { %v1027_v19 = vpop.eup %1026 }
 0x144   : > { %v238_v21 = vmul.f32 %v1027_v19, %v230_v4 }
 0x146   : > { %v245_v23 = vmul.f32 %v907_v20, %v238_v21 }
 0x148   : > { %v252_v24 = vadd.f32 %v908_v22, %v245_v23 }
 0x14a   : > { %v253_v25 = vpack.c.bf16 %v252_v24, %v252_v24 }
 0x14c   : > { %917 = vmatmul.mubr.msk.bf16.vlgmr.msra.gmra.mrb[0].mxu0 %vm302_vm1, %v253_v25 }
 0x14d   : > { %961 = vmatprep.mubr.msk.bf16.mxu0 %vm1054_vm2, %v1053_v26 }
 0x21f   : > { %v340_v27 = vpop.f32.mrb[0].mxu0 }
 0x220   : > { %v347_v28 = vpack.c.bf16 %v340_v27, %v340_v27  ;;  %v342_v29 = vpop.f32.mrb[1].mxu0 }
 0x221   : > { %v344_v30 = vpop.f32.mrb[2].mxu0  ;;  %v1151_v35 = vpack.c.bf16 %v342_v29, %v342_v29 }
 0x222   : > { %467 = vrot.lane.b32.xlu0 %v347_v28, %s1055_s21  ;;  %351 = vrot.lane.b32.xlu1 %v347_v28, %s1056_s22  ;;  %v345_v31 = vpop.f32.mrb[3].mxu0 }
 0x223   : > { %v420_v38 = vsel %vm418_vm4, %v1151_v35, 0 }
 0x226   : > { %469 = vrot.lane.b32.xlu1 %v347_v28, %s1057_s23 }
 0x22a   : > { %597 = vrot.lane.b32.xlu1 %v347_v28, %s1058_s24 }
 0x22e   : > { %595 = vrot.lane.b32.xlu1 %v347_v28, %s1059_s25 }
 0x232   : > { %724 = vrot.lane.b32.xlu1 %v347_v28, %s1060_s26 }
 0x236   : > { %722 = vrot.lane.b32.xlu1 %v347_v28, %s1061_s27 }
 0x294   : > { %v352_v32 = vpop.permute.xlu1 %351  ;;  %v468_v39 = vpop.permute.xlu0 %467 }
 0x295   : > { %v358_v33 = vsel %vm353_vm3, %v352_v32, 0 }
 0x296   : > { %948 = vmatpush3.bf16.xpose.msra.mxu1 %v358_v33 }
 0x297   : > { %953 = vmatprep.subr.bf16.mxu1 %v1053_v26 }
 0x298   : > { %v470_v34 = vpop.permute.xlu1 %469 }
 0x299   : > { %v475_v36 = vsel %vm353_vm3, %v470_v34, 0 }
 0x29a   : > { %960 = vmatpush3.bf16.xpose.msra.mxu0 %v475_v36 }
 0x29b   : > { %971 = vmatprep.subr.bf16.mxu0 %v1053_v26 }
 0x29c   : > { %v598_v37 = vpop.permute.xlu1 %597 }
 0x29d   : > { %950 = vmatmul.mubr.msk.bf16.vlgmr.msra.gmra.mrb[0].mxu1 %vm353_vm3, %v347_v28  ;;  %v603_v41 = vsel %vm353_vm3, %v598_v37, 0 }
 0x29e   : > { %954 = vmatpush3.bf16.msra.mxu1 %v420_v38  ;;  %955 = vmatprep.mubr.msk.bf16.mxu1 %vm1054_vm2, %v1053_v26 }
 0x29f   : > { %965 = vmatprep.subr.bf16.mxu1 %v1053_v26 }
 0x2a0   : > { %v596_v40 = vpop.permute.xlu1 %595 }
 0x2a1   : > { %962 = vmatmul.mubr.msk.bf16.vlgmr.msra.gmra.mrb[4].mxu0 %vm353_vm3, %v468_v39 }
 0x2a2   : > { %972 = vmatpush3.bf16.xpose.msra.mxu0 %v603_v41  ;;  %973 = vmatprep.mubr.msk.bf16.mxu0 %vm1054_vm2, %v1053_v26 }
 0x2a3   : > { %983 = vmatprep.subr.bf16.mxu0 %v1053_v26 }
 0x2a4   : > { %v725_v42 = vpop.permute.xlu1 %724 }
 0x2a5   : > { %v730_v43 = vsel %vm353_vm3, %v725_v42, 0 }
 0x2a8   : > { %v723_v44 = vpop.permute.xlu1 %722 }
 0x2a9   : > { %974 = vmatmul.mubr.msk.bf16.vlgmr.msra.gmra.mrb[8].mxu0 %vm353_vm3, %v596_v40 }
 0x2aa   : > { %984 = vmatpush3.bf16.xpose.msra.mxu0 %v730_v43  ;;  %985 = vmatprep.mubr.msk.bf16.mxu0 %vm1054_vm2, %v1053_v26 }
 0x2b1   : > { %986 = vmatmul.mubr.msk.bf16.vlgmr.msra.gmra.mrb[12].mxu0 %vm353_vm3, %v723_v44 }
 0x370   : > { %v394_v46 = vpop.f32.mrb[0].mxu1 }
 0x371   : > { %v395_v47 = vadd.f32 %v394_v46, %v349_v45  ;;  %v951_v48 = vpop.f32.mrb[1].mxu1 }
 0x372   : > { %v397_v49 = vpop.f32.mrb[2].mxu1 }
 0x373   : > { %v952_v51 = vpop.f32.mrb[3].mxu1  ;;  %v401_v52 = vsel %vm400_vm5, %v395_v47, -inf }
 0x374   : > { %402 = vmax.xlane.f32.xlu1 %v401_v52  ;;  %v511_v53 = vpop.f32.mrb[4].mxu0  ;;  %v1062_v52 = vmov 1983009808  }
 0x375   : > { %v512_v54 = vadd.f32 %v920_v50, %v511_v53  ;;  %v963_v55 = vpop.f32.mrb[5].mxu0  ;;  %v582_v53 = vunpack.c.l.s4 %v1062_v52 }
 0x376   : > { %v514_v56 = vpop.f32.mrb[6].mxu0 }
 0x377   : > { %v964_v57 = vpop.f32.mrb[7].mxu0  ;;  %v517_v58 = vsel %vm400_vm5, %v512_v54, -inf }
 0x378   : > { %518 = vmax.xlane.f32.xlu0 %v517_v58 }
 0x37c   : > { %v639_v60 = vpop.f32.mrb[8].mxu0 }
 0x37d   : > { %v640_v61 = vadd.f32 %v923_v59, %v639_v60  ;;  %v975_v62 = vpop.f32.mrb[9].mxu0  ;;  %v583_v59 = vunpack.c.0.s8 %v582_v53 }
 0x37e   : > { %v642_v63 = vpop.f32.mrb[10].mxu0 }
 0x37f   : > { %v976_v0 = vpop.f32.mrb[11].mxu0  ;;  %v645_v1 = vsel %vm400_vm5, %v640_v61, -inf }
 0x380   : > { %646 = vmax.xlane.f32.xlu1 %v645_v1 }
 0x384   : > { %v766_v3 = vpop.f32.mrb[12].mxu0 }
 0x385   : > { %v767_v4 = vadd.f32 %v926_v2, %v766_v3  ;;  %v987_v5 = vpop.f32.mrb[13].mxu0 }
 0x386   : > { %v769_v6 = vpop.f32.mrb[14].mxu0 }
 0x387   : > { %v988_v7 = vpop.f32.mrb[15].mxu0  ;;  %v772_v8 = vsel %vm400_vm5, %v767_v4, -inf }
 0x388   : > { %773 = vmax.xlane.f32.xlu0 %v772_v8 }
 0x401   : > { %v403_v9 = vpop.xlane.xlu1 %402 }
 0x402   : > { %v404_v10 = vsub.f32 %v395_v47, %v403_v9 }
 0x404   : > { %v405_v11 = vmul.f32 1.442695, %v404_v10 }
 0x405   : > { %v519_v12 = vpop.xlane.xlu0 %518 }
 0x406   : > { %1028 = vpow2.f32 %v405_v11  ;;  %v520_v13 = vsub.f32 %v512_v54, %v519_v12  ;;  %v584_v54 = vlaneseq }
 0x408   : > { %v521_v14 = vmul.f32 1.442695, %v520_v13  ;;  %v585_v60 = vshrl.u32 %v584_v54, 7 }
 0x40a   : > { %1030 = vpow2.f32 %v521_v14 }
 0x40d   : > { %v647_v24 = vpop.xlane.xlu1 %646 }
 0x40e   : > { %v648_v25 = vsub.f32 %v640_v61, %v647_v24  ;;  %v586_v61 = vsub.s32 %v583_v59, %v585_v60 }
 0x410   : > { %v1029_v15 = vpop.eup %1028  ;;  %v649_v27 = vmul.f32 1.442695, %v648_v25 }
 0x411   : > { %v407_v16 = vsel %vm400_vm5, %v1029_v15, 0.0 }
 0x412   : > { %408 = vadd.xlane.f32.xlu1 %v407_v16 }
 0x414   : > { %v1031_v17 = vpop.eup %1030 }
 0x415   : > { %v774_v18 = vpop.xlane.xlu0 %773  ;;  %v523_v19 = vsel %vm400_vm5, %v1031_v17, 0.0 }
 0x416   : > { %v775_v20 = vsub.f32 %v767_v4, %v774_v18  ;;  %524 = vadd.xlane.f32.xlu0 %v523_v19 }
 0x418   : > { %v776_v21 = vmul.f32 1.442695, %v775_v20 }
 0x41a   : > { %1032 = vpow2.f32 %v776_v21 }
 0x41b   : > { %1034 = vpow2.f32 %v649_v27 }
 0x423   : > { %531 = vrot.lane.b32.xlu1 %v1151_v35, %s1055_s21 }
 0x424   : > { %v1033_v22 = vpop.eup %1032 }
 0x425   : > { %v778_v23 = vsel %vm400_vm5, %v1033_v22, 0.0  ;;  %v1035_v28 = vpop.eup %1034 }
 0x426   : > { %779 = vadd.xlane.f32.xlu0 %v778_v23  ;;  %v651_v29 = vsel %vm400_vm5, %v1035_v28, 0.0 }
 0x43c   : > { %658 = vrot.lane.b32.xlu0 %v1151_v35, %s1059_s25 }
 0x447   : > { %652 = vadd.xlane.f32.xlu1 %v651_v29 }
 0x458   : > { %785 = vrot.lane.b32.xlu1 %v1151_v35, %s1061_s27 }
 0x49f   : > { %v409_v30 = vpop.xlane.xlu1 %408 }
 0x4a0   : > { %1036 = vrcp.f32 %v409_v30 }
 0x4a3   : > { %v525_v31 = vpop.xlane.xlu0 %524  ;;  %v532_v34 = vpop.permute.xlu1 %531 }
 0x4a4   : > { %1038 = vrcp.f32 %v525_v31  ;;  %v537_v38 = vsel %vm418_vm4, %v532_v34, 0 }
 0x4aa   : > { %v1037_v32 = vpop.eup %1036 }
 0x4ab   : > { %v412_v33 = vmul.f32 %v1037_v32, %v1029_v15 }
 0x4ad   : > { %v413_v36 = vpack.c.bf16 %v412_v33, %v412_v33 }
 0x4ae   : > { %v1039_v37 = vpop.eup %1038 }
 0x4af   : > { %956 = vmatmul.mubr.msk.bf16.vlgmr.msra.gmra.mrb[4].mxu1 %vm414_vm6, %v413_v36  ;;  %v528_v39 = vmul.f32 %v1039_v37, %v1031_v17 }
 0x4b0   : > { %966 = vmatpush3.bf16.msra.mxu1 %v537_v38  ;;  %967 = vmatprep.mubr.msk.bf16.mxu1 %vm1054_vm2, %v1053_v26 }
 0x4b1   : > { %977 = vmatprep.subr.bf16.mxu1 %v1053_v26  ;;  %v529_v40 = vpack.c.bf16 %v528_v39, %v528_v39 }
 0x4b3   : > { %v780_v35 = vpop.xlane.xlu0 %779 }
 0x4b7   : > { %968 = vmatmul.mubr.msk.bf16.vlgmr.msra.gmra.mrb[8].mxu1 %vm414_vm6, %v529_v40  ;;  %v659_v41 = vpop.permute.xlu0 %658 }
 0x4b8   : > { %v664_v42 = vsel %vm418_vm4, %v659_v41, 0  ;;  %979 = vmatprep.mubr.msk.bf16.mxu1 %vm1054_vm2, %v1053_v26 }
 0x4b9   : > { %978 = vmatpush3.bf16.msra.mxu1 %v664_v42 }
 0x4ba   : > { %989 = vmatprep.subr.bf16.mxu1 %v1053_v26 }
 0x4d4   : > { %v653_v43 = vpop.xlane.xlu1 %652 }
 0x4d5   : > { %1040 = vrcp.f32 %v653_v43 }
 0x4d6   : > { %1042 = vrcp.f32 %v780_v35 }
 0x4d8   : > { %v786_v46 = vpop.permute.xlu1 %785 }
 0x4d9   : > { %v791_v49 = vsel %vm418_vm4, %v786_v46, 0 }
 0x4df   : > { %v1041_v44 = vpop.eup %1040 }
 0x4e0   : > { %v656_v45 = vmul.f32 %v1041_v44, %v1035_v28  ;;  %v1043_v48 = vpop.eup %1042 }
 0x4e1   : > { %v783_v50 = vmul.f32 %v1043_v48, %v1033_v22 }
 0x4e2   : > { %v657_v47 = vpack.c.bf16 %v656_v45, %v656_v45 }
 0x4e3   : > { %v784_v51 = vpack.c.bf16 %v783_v50, %v783_v50 }
 0x4e4   : > { %980 = vmatmul.mubr.msk.bf16.vlgmr.msra.gmra.mrb[12].mxu1 %vm414_vm6, %v657_v47 }
 0x4e5   : > { %990 = vmatpush3.bf16.msra.mxu1 %v791_v49  ;;  %991 = vmatprep.mubr.msk.bf16.mxu1 %vm1054_vm2, %v1053_v26 }
 0x4ec   : > { %992 = vmatmul.mubr.msk.bf16.vlgmr.msra.gmra.mrb[16].mxu1 %vm414_vm6, %v784_v51 }
 0x582   : > { %v456_v55 = vpop.f32.mrb[4].mxu1 }
 0x583   : > { %v462_v56 = vpack.c.bf16 %v456_v55, %v456_v55  ;;  %v957_v57 = vpop.f32.mrb[5].mxu1 }
 0x584   : > { %v459_v58 = vpop.f32.mrb[6].mxu1 }
 0x585   : > { %464 = vst.msk [vmem:[%s1216_s14] sm:$0x3] %vm463_vm7, %v462_v56  ;;  %v958_v26 = vpop.f32.mrb[7].mxu1 }
 0x58a   : > { %v573_v62 = vpop.f32.mrb[8].mxu1 }
 0x58b   : > { %v579_v63 = vpack.c.bf16 %v573_v62, %v573_v62  ;;  %v969_v0 = vpop.f32.mrb[9].mxu1 }
 0x58c   : > { %v576_v1 = vpop.f32.mrb[10].mxu1 }
 0x58d   : > { %v587_v2 = vrot.slane %v579_v63, %v586_v61  ;;  %v970_v3 = vpop.f32.mrb[11].mxu1 }
 0x58f   : > { %588 = vrot.lane.b32.xlu1 %v587_v2, %s1060_s26 }
 0x5b7   : > { %v700_v4 = vpop.f32.mrb[12].mxu1 }
 0x5b8   : > { %v706_v5 = vpack.c.bf16 %v700_v4, %v700_v4  ;;  %v981_v6 = vpop.f32.mrb[13].mxu1 }
 0x5b9   : > { %v703_v7 = vpop.f32.mrb[14].mxu1 }
 0x5ba   : > { %v714_v8 = vrot.slane %v706_v5, %v586_v61  ;;  %v982_v9 = vpop.f32.mrb[15].mxu1 }
 0x5bc   : > { %715 = vrot.lane.b32.xlu0 %v714_v8, %s1058_s24 }
 0x5bf   : > { %v827_v10 = vpop.f32.mrb[16].mxu1 }
 0x5c0   : > { %v833_v11 = vpack.c.bf16 %v827_v10, %v827_v10  ;;  %v993_v12 = vpop.f32.mrb[17].mxu1 }
 0x5c1   : > { %v830_v13 = vpop.f32.mrb[18].mxu1 }
 0x5c2   : > { %v841_v14 = vrot.slane %v833_v11, %v586_v61  ;;  %v994_v15 = vpop.f32.mrb[19].mxu1 }
 0x5c4   : > { %842 = vrot.lane.b32.xlu1 %v841_v14, %s1057_s23 }
 0x601   : > { %v589_v16 = vpop.permute.xlu1 %588 }
 0x602   : > { %592 = vst.msk [vmem:[%s1216_s14] sm:$0x3] %vm591_vm8, %v589_v16 }
 0x62e   : > { %v716_v17 = vpop.permute.xlu0 %715 }
 0x62f   : > { %719 = vst.msk [vmem:[%s1216_s14] sm:$0x3] %vm718_vm9, %v716_v17 }
 0x636   : > { %v843_v18 = vpop.permute.xlu1 %842 }
 0x637   : > { %846 = vst.msk [vmem:[%s1216_s14] sm:$0x3] %vm845_vm10, %v843_v18 }
 0x638 PF: > { %s15_s18 = sadd.s32 1, %s1050_s18  }
 0x639   : > { %p12_p4 = scmp.ge.s32.totalorder %s15_s18, 4  }
 0x63b   :  { %14 = sbr.rel (!%p12_p4) target bundleno = 1 (0x1), region = 73 }

// kernel: vit_forward.9
= control target key start
LH: loop header
LB: loop body
LE: loop exit
PB: predicated region body
PF: predicated region fallthrough
CT: control target
= control target key end

     0   :  { %v639_v1 = vmov 0.0   ;;  %vm640_vm0 = vmmov 0   ;;  %vm130_vm1 = vcmask 523264   ;;  %s843_s0 = inlined_call_operand.vmem [shape: bf16[8,64], index: 0, kind: input, shape index: {}]   ;;  %s844_s1 = inlined_call_operand.vmem [shape: f32[8,64], index: 1, kind: input, shape index: {}]   ;;  %s845_s2 = inlined_call_operand.vmem [shape: bf16[64,64], index: 2, kind: input, shape index: {}]   ;;  %s846_s3 = inlined_call_operand.vmem [shape: f32[1,64], index: 3, kind: input, shape index: {}]   ;;  %s847_s4 = inlined_call_operand.vmem [shape: f32[1,64], index: 4, kind: input, shape index: {}]   ;;  %s848_s5 = inlined_call_operand.vmem [shape: f32[1,64], index: 5, kind: input, shape index: {}]   ;;  %s849_s6 = inlined_call_operand.vmem [shape: bf16[64,256], index: 6, kind: input, shape index: {}]   ;;  %s850_s7 = inlined_call_operand.vmem [shape: f32[1,256], index: 7, kind: input, shape index: {}]   ;;  %s851_s8 = inlined_call_operand.vmem [shape: bf16[256,64], index: 8, kind: input, shape index: {}]   ;;  %s852_s9 = inlined_call_operand.vmem [shape: f32[1,64], index: 9, kind: input, shape index: {}]   ;;  %s853_s10 = inlined_call_operand.vmem [shape: f32[1,64], index: 10, kind: input, shape index: {}]   ;;  %s854_s11 = inlined_call_operand.vmem [shape: f32[1,64], index: 11, kind: input, shape index: {}]   ;;  %s855_s12 = inlined_call_operand.hbm [shape: f32[8,64], index: 12, kind: output, shape index: {}]  }
   0x1   :  { %v575_v0 = vld [vmem:[%s845_s2] sm:$0xff]   ;;  %559 = vmatprep.subr.bf16.mxu1 %v639_v1  ;;  %v576_v2 = vld [vmem:[%s845_s2 + $0x8] sm:$0xff]   ;;  %567 = vmatprep.mubr.msk.bf16.mxu1 %vm640_vm0, %v639_v1  ;;  %v577_v3 = vld [vmem:[%s845_s2 + $0x10] sm:$0xff]  }
   0x2   :  { %560 = vmatpush3.bf16.msra.mxu1 %v575_v0  ;;  %v578_v4 = vld [vmem:[%s845_s2 + $0x18] sm:$0xff]   ;;  %v43_v5 = vld [vmem:[%s843_s0] sm:$0xf] }
   0x3   :  { %561 = vmatprep.subr.bf16.mxu1 %v639_v1 }
   0x6   :  { %562 = vmatpush3.bf16.msra.mxu1 %v576_v2 }
   0x7   :  { %563 = vmatprep.subr.bf16.mxu1 %v639_v1 }
   0xa   :  { %564 = vmatpush3.bf16.msra.mxu1 %v577_v3 }
   0xb   :  { %565 = vmatprep.subr.bf16.mxu1 %v639_v1 }
   0xe   :  { %566 = vmatpush3.bf16.msra.mxu1 %v578_v4 }
  0x11   :  { %568 = vmatmul.mubr.msk.bf16.vlgmr.msra.gmra.mrb[0].mxu1 %vm130_vm1, %v43_v5 }
  0x12   :  { %17 = vsyncpa [#allocation3], 0  ;;  %v496_v6 = vld [vmem:[%s846_s3] ss:$0 sm:$0xff]  ;;  %v581_v20 = vld [vmem:[%s849_s6 + $0x4] ss:$8 sps:$4 sm:$0xff]   ;;  %v205_v55 = vlaneseq }
  0x13   :  { %v44_v7 = vld [vmem:[%s844_s1] sm:$0xff]  ;;  %258 = vmatprep.subr.bf16.mxu1 %v581_v20  ;;  %v584_v22 = vld [vmem:[%s849_s6 + $0x14] ss:$8 sps:$4 sm:$0xff]   ;;  %v582_v23 = vld [vmem:[%s849_s6 + $0x10] ss:$8 sps:$4 sm:$0xff]   ;;  %v641_v28 = vmov 0  }
  0x14   :  { %v579_v21 = vld [vmem:[%s849_s6] ss:$8 sps:$4 sm:$0xff]   ;;  %v587_v24 = vld [vmem:[%s849_s6 + $0x24] ss:$8 sps:$4 sm:$0xff]   ;;  %v588_v26 = vld [vmem:[%s849_s6 + $0x30] ss:$8 sps:$4 sm:$0xff]   ;;  %290 = vmatprep.mubr.bf16.mxu1 %v641_v28 }
  0x15   :  { %259 = vmatpush1.bf16.msra.mxu1 %v579_v21  ;;  %v585_v25 = vld [vmem:[%s849_s6 + $0x20] ss:$8 sps:$4 sm:$0xff]   ;;  %v590_v27 = vld [vmem:[%s849_s6 + $0x34] ss:$8 sps:$4 sm:$0xff]   ;;  %v206_v56 = vshrl.u32 %v205_v55, 7 }
  0x16   :  { %260 = vmatprep.subr.bf16.mxu1 %v584_v22  ;;  %v591_v29 = vld [vmem:[%s851_s8 + $0x40] sm:$0xff]   ;;  %v593_v31 = vld [vmem:[%s851_s8 + $0x48] sm:$0xff]   ;;  %v595_v43 = vld [vmem:[%s851_s8 + $0x50] sm:$0xff]  }
  0x17   :  { %v592_v30 = vld [vmem:[%s851_s8] sm:$0xff]   ;;  %537 = vmatprep.subr.bf16.mxu0 %v591_v29  ;;  %v594_v32 = vld [vmem:[%s851_s8 + $0x8] sm:$0xff]   ;;  %v596_v44 = vld [vmem:[%s851_s8 + $0x10] sm:$0xff]   ;;  %v207_v57 = vsub.s32 0, %v206_v56  ;;  %v211_v59 = vsub.s32 1, %v206_v56 }
  0x18   :  { %538 = vmatpush3.bf16.msra.mxu0 %v592_v30  ;;  %v502_v37 = vld [vmem:[%s847_s4] ss:$0 sm:$0xff]  ;;  %v597_v45 = vld [vmem:[%s851_s8 + $0x58] sm:$0xff]   ;;  %v601_v49 = vld [vmem:[%s851_s8 + $0x68] sm:$0xff]   ;;  %s642_s4 = smov [#allocation2]  }
  0x19   :  { %261 = vmatpush1.bf16.msra.mxu1 %v582_v23  ;;  %539 = vmatprep.subr.bf16.mxu0 %v593_v31  ;;  %v503_v39 = vld [vmem:[%s848_s5] ss:$0 sm:$0xff]  ;;  %v598_v46 = vld [vmem:[%s851_s8 + $0x18] sm:$0xff]   ;;  %v602_v50 = vld [vmem:[%s851_s8 + $0x28] sm:$0xff]   ;;  %s488_s22 = sshll.u32 %s642_s4, 4  ;;  %s489_s22 = int_to_ptr.vmem [resolvable:$true] %s488_s22 }
  0x1a   :  { %262 = vmatprep.subr.bf16.mxu1 %v587_v24  ;;  %v599_v47 = vld [vmem:[%s851_s8 + $0x60] sm:$0xff]   ;;  %v603_v51 = vld [vmem:[%s851_s8 + $0x70] sm:$0xff]   ;;  %v605_v53 = vld [vmem:[%s851_s8 + $0x78] sm:$0xff]   ;;  %s615_s5 = scalar_lea.vmem %s489_s22, 128  ;;  %p620_p1 = scmp.lt.s32.totalorder %s489_s22, %s489_s22 }
  0x1b   :  { %v600_v48 = vld [vmem:[%s851_s8 + $0x20] sm:$0xff]   ;;  %v604_v52 = vld [vmem:[%s851_s8 + $0x30] sm:$0xff]   ;;  %v606_v54 = vld [vmem:[%s851_s8 + $0x38] sm:$0xff]   ;;  %p616_p0 = scmp.ne.s32.totalorder %s489_s22, %s615_s5  ;;  %p621_p2 = scmp.lt.s32.totalorder %s615_s5, %s615_s5 }
  0x1c   :  { %540 = vmatpush3.bf16.msra.mxu0 %v594_v32  ;;  %v64_v58 = vld [vmem:[%s850_s7] sm:$0x3] }
  0x1d   :  { %263 = vmatpush1.bf16.msra.mxu1 %v585_v25  ;;  %541 = vmatprep.subr.bf16.mxu0 %v595_v43  ;;  %v208_v60 = vrot.slane %v64_v58, %v207_v57  ;;  %v212_v61 = vrot.slane %v64_v58, %v211_v59  ;;  %p622_p3 = por %p621_p2, %p620_p1 }
  0x1e   :  { %264 = vmatprep.subr.bf16.mxu1 %v590_v27 }
  0x1f   :  { %p623_p4 = pnand %p622_p3, %p616_p0 }
  0x20   :  { %542 = vmatpush3.bf16.msra.mxu0 %v596_v44 }
  0x21   :  { %265 = vmatpush1.bf16.msra.mxu1 %v588_v26  ;;  %543 = vmatprep.subr.bf16.mxu0 %v597_v45 }
  0x24   :  { %544 = vmatpush3.bf16.msra.mxu0 %v598_v46 }
  0x25   :  { %545 = vmatprep.subr.bf16.mxu0 %v599_v47 }
  0x28   :  { %546 = vmatpush3.bf16.msra.mxu0 %v600_v48 }
  0x29   :  { %547 = vmatprep.subr.bf16.mxu0 %v601_v49 }
  0x2c   :  { %548 = vmatpush3.bf16.msra.mxu0 %v602_v50 }
  0x2d   :  { %549 = vmatprep.subr.bf16.mxu0 %v603_v51 }
  0x30   :  { %550 = vmatpush3.bf16.msra.mxu0 %v604_v52 }
  0x31   :  { %551 = vmatprep.subr.bf16.mxu0 %v605_v53 }
  0x34   :  { %552 = vmatpush3.bf16.msra.mxu0 %v606_v54 }
  0xe4   :  { %v168_v8 = vpop.f32.mrb[0].mxu1 }
  0xe5   :  { %v169_v9 = vadd.f32 %v496_v6, %v168_v8  ;;  %v569_v10 = vpop.f32.mrb[1].mxu1 }
  0xe6   :  { %v171_v11 = vpop.f32.mrb[2].mxu1 }
  0xe7   :  { %v730_v12 = vadd.f32 %v169_v9, %v44_v7  ;;  %v570_v13 = vpop.f32.mrb[3].mxu1 }
  0xe9   :  { %v175_v14 = vsel %vm130_vm1, %v730_v12, 0.0 }
  0xea   :  { %176 = vadd.xlane.f32.xlu0 %v175_v14 }
 0x177   :  { %v177_v15 = vpop.xlane.xlu0 %176 }
 0x178   :  { %v179_v16 = vmul.f32 0.015625, %v177_v15 }
 0x17a   :  { %v180_v17 = vsub.f32 %v730_v12, %v179_v16 }
 0x17c   :  { %v181_v18 = vmul.f32 %v180_v17, %v180_v17 }
 0x17e   :  { %v182_v19 = vsel %vm130_vm1, %v181_v18, 0.0  ;;  %v513_v18 = vld [vmem:[%s852_s9] ss:$0 sm:$0xff] }
 0x17f   :  { %183 = vadd.xlane.f32.xlu0 %v182_v19 }
 0x20c   :  { %v184_v33 = vpop.xlane.xlu0 %183 }
 0x20d   :  { %v185_v34 = vmul.f32 0.015625, %v184_v33 }
 0x20f   :  { %v186_v35 = vadd.f32 1e-05, %v185_v34 }
 0x211   :  { %607 = vrsqrt.f32 %v186_v35  ;;  %v530_v35 = vld [vmem:[%s853_s10] ss:$0 sm:$0xff] }
 0x21b   :  { %v608_v36 = vpop.eup %607 }
 0x21c   :  { %v188_v38 = vmul.f32 %v608_v36, %v180_v17  ;;  %v531_v36 = vld [vmem:[%s854_s11] ss:$0 sm:$0xff] }
 0x21e   :  { %v195_v40 = vmul.f32 %v502_v37, %v188_v38 }
 0x220   :  { %v202_v41 = vadd.f32 %v503_v39, %v195_v40 }
 0x222   :  { %v203_v42 = vpack.c.bf16 %v202_v41, %v202_v41 }
 0x224   :  { %512 = vmatmul.mubr.msk.bf16.vlgmr.msra.gmra.mrb[4].mxu1 %vm130_vm1, %v203_v42 }
 0x2f7   :  { %v292_v62 = vpop.f32.mrb[4].mxu1 }
 0x2f8   :  { %v293_v63 = vadd.f32 %v292_v62, %v208_v60  ;;  %v294_v0 = vpop.f32.mrb[5].mxu1 }
 0x2f9   :  { %v295_v1 = vadd.f32 %v294_v0, %v212_v61  ;;  %v296_v2 = vpop.f32.mrb[6].mxu1 }
 0x2fa   :  { %v301_v3 = vmul.f32 0.70710677, %v293_v63  ;;  %v297_v4 = vpop.f32.mrb[7].mxu1  ;;  %v299_v8 = vmul.f32 0.5, %v293_v63 }
 0x2fb   :  { %v302_v5 = vmul.f32 0.70710677, %v295_v1  ;;  %v300_v10 = vmul.f32 0.5, %v295_v1 }
 0x2fc   :  { %609 = verf.f32 %v301_v3 }
 0x2fd   :  { %611 = verf.f32 %v302_v5 }
 0x306   :  { %v610_v6 = vpop.eup %609 }
 0x307   :  { %v612_v7 = vpop.eup %611  ;;  %v305_v9 = vadd.f32 1.0, %v610_v6 }
 0x308   :  { %v306_v11 = vadd.f32 1.0, %v612_v7 }
 0x309   :  { %v307_v13 = vmul.f32 %v305_v9, %v299_v8 }
 0x30a   :  { %v308_v14 = vmul.f32 %v306_v11, %v300_v10 }
 0x30b   :  { %v309_v16 = vpack.c.bf16 %v307_v13, %v307_v13 }
 0x30c   :  { %v310_v15 = vpack.c.bf16 %v308_v14, %v308_v14 }
 0x30e   :  { %445 = vmatprep.mubr.bf16.mxu0 %v310_v15 }
 0x30f   :  { %446 = vmatmul.mubr.bf16.vlgmr.msra.gmra.mrb[0].mxu0 %v309_v16 }
 0x3e2   :  { %v553_v17 = vpop.f32.mrb[0].mxu0 }
 0x3e3   :  { %v554_v19 = vpop.f32.mrb[1].mxu0 }
 0x3e4   :  { %v555_v20 = vadd.f32 %v554_v19, %v553_v17  ;;  %v556_v21 = vpop.f32.mrb[2].mxu0 }
 0x3e5   :  { %v557_v22 = vpop.f32.mrb[3].mxu0 }
 0x3e6   :  { %v448_v23 = vadd.f32 %v555_v20, %v513_v18 }
 0x3e8   :  { %v453_v24 = vadd.f32 %v448_v23, %v730_v12 }
 0x3ea   :  { %v454_v25 = vsel %vm130_vm1, %v453_v24, 0.0 }
 0x3eb   :  { %455 = vadd.xlane.f32.xlu1 %v454_v25 }
 0x478   :  { %v456_v26 = vpop.xlane.xlu1 %455 }
 0x479   :  { %v457_v27 = vmul.f32 0.015625, %v456_v26 }
 0x47b   :  { %v458_v28 = vsub.f32 %v453_v24, %v457_v27 }
 0x47d   :  { %v459_v29 = vmul.f32 %v458_v28, %v458_v28 }
 0x47f   :  { %v460_v30 = vsel %vm130_vm1, %v459_v29, 0.0 }
 0x480   :  { %461 = vadd.xlane.f32.xlu1 %v460_v30 }
 0x50d   :  { %v462_v31 = vpop.xlane.xlu1 %461 }
 0x50e   :  { %v463_v32 = vmul.f32 0.015625, %v462_v31 }
 0x510   :  { %v464_v33 = vadd.f32 1e-05, %v463_v32 }
 0x512   :  { %613 = vrsqrt.f32 %v464_v33 }
 0x51c   :  { %v614_v34 = vpop.eup %613 }
 0x51d   :  { %v466_v12 = vmul.f32 %v614_v34, %v458_v28 }
 0x51f   :  { %v473_v37 = vmul.f32 %v530_v35, %v466_v12 }
 0x521   :  { %v480_v38 = vadd.f32 %v531_v36, %v473_v37 }
 0x523   :  { %481 = vst.msk [vmem:[#allocation2] sm:$0xff] %vm130_vm1, %v480_v38 }
 0x524   :  { %626 = shalt.err (!%p623_p4)
}
 0x525   :  { %s627_s24 = scalar_lea.hbm %s855_s12, 128 }
 0x526   :  { %p628_p5 = scmp.ne.s32.totalorder %s855_s12, %s627_s24  ;;  %p631_p6 = scmp.lt.u32.totalorder %s627_s24, %s855_s12 }
 0x528   :  { %p633_p7 = pnand %p631_p6, %p628_p5 }
 0x52a   :  { %636 = shalt.err (!%p633_p7)
}
 0x52b   :  { %491 = dma.vmem_to_hbm [thread:$0]  %s489_s22, 128, %s855_s12, [#allocation3]  }
 0x52c   :  { %637 = dma.done.wait [#allocation3], 128  }
 0x52d   :  { %638 = vsyncadd [#allocation3], 4294967168 }
 0x52e   :  { %495 = vsyncpa [#allocation3], 1 }

</bundles_post_ra>
